<compile_context>
chip_gen: v6e
topology: v6e:2x2x1
jax: 0.10.0
libtpu: 0.0.40
codegen_flags: <defaults>
</compile_context>

<pallas_src>
import functools

import numpy as np
import jax
import jax.numpy as jnp
from jax.experimental import pallas as pl
from jax.experimental.pallas import tpu as pltpu


def _round_up(x, m):
    return ((x + m - 1) // m) * m


def _resblock2d_kernel(x_ref,            # VMEM (N, C, H*W)   f32
                       w0_ref, w1_ref,   # VMEM (K*K, C, C)   f32  [tap, c_out, c_in]
                       m_ref,            # VMEM (K+1, ACC)    f32  rows 0..K-1: column masks, row K: interior
                       g0_ref, be0_ref,  # VMEM (C, 1)        f32  BN affine (block0)
                       g1_ref, be1_ref,  # VMEM (C, 1)        f32  BN affine (block1)
                       out_ref,          # VMEM (N, C, H*W)   f32
                       xf_ref, hf_ref,   # VMEM scratch (C, L_TOT) f32  (flat padded activations)
                       *, N, C, H, W, K, BASE, ACC, L_TOT, eps):
    P = K // 2
    R = H + 2 * P              # padded rows per image
    S = R * W                  # flat padded length per image
    HW = H * W
    inv_count = 1.0 / float(N * HW)

    # Hoisted mask rows (values, reused by both convs / both BNs).
    m_int = m_ref[K:K + 1, :]                                   # (1, ACC) interior mask
    col_mask = {dw: m_ref[P + dw:P + dw + 1, :]
                for dw in range(-P, P + 1) if dw != 0}          # (1, ACC) each

    def conv(src_ref, w_ref):
        # KxK 'same' conv as K*K per-tap MXU matmuls on the flat padded layout.
        acc = jnp.zeros((C, ACC), jnp.float32)
        for kh in range(K):
            dh = kh - P
            for kw in range(K):
                dw = kw - P
                off = dh * W + dw
                slab = src_ref[:, BASE + off:BASE + off + ACC]   # (C, ACC)
                if dw != 0:
                    # zero reads that crossed a row (W) boundary
                    slab = slab * col_mask[dw]
                acc = acc + jnp.dot(w_ref[kh * K + kw, :, :], slab,
                                    preferred_element_type=jnp.float32)
        return acc

    def batchnorm(y, g_ref, b_ref):
        # Training-mode BN: batch mean / biased variance over N*H*W, single pass.
        ym = y * m_int                                           # exclude padding / junk lanes
        s1 = jnp.sum(ym, axis=1, keepdims=True)                  # (C, 1)
        s2 = jnp.sum(ym * y, axis=1, keepdims=True)              # (C, 1) = sum(mask * y^2)
        mean = s1 * inv_count
        var = s2 * inv_count - mean * mean
        scale = jax.lax.rsqrt(var + eps) * g_ref[...]            # (C, 1)
        shift = b_ref[...] - mean * scale
        return y * scale + shift                                 # broadcast over lanes

    # ---- build the zero-padded flat input (zero only the border strips) ----
    prev = 0
    for n in range(N):
        start = BASE + n * S + P * W                             # contiguous interior block of image n
        if start > prev:
            xf_ref[:, prev:start] = jnp.zeros((C, start - prev), jnp.float32)
        xf_ref[:, start:start + HW] = x_ref[n, :, :]
        prev = start + HW
    if L_TOT > prev:
        xf_ref[:, prev:L_TOT] = jnp.zeros((C, L_TOT - prev), jnp.float32)

    # ---- block0: conv -> BN -> ReLU  (stored back in padded-flat form) ----
    h = jnp.maximum(batchnorm(conv(xf_ref, w0_ref), g0_ref, be0_ref), 0.0) * m_int
    if BASE > 0:
        hf_ref[:, 0:BASE] = jnp.zeros((C, BASE), jnp.float32)
    hf_ref[:, BASE:BASE + ACC] = h
    if L_TOT > BASE + ACC:
        hf_ref[:, BASE + ACC:L_TOT] = jnp.zeros((C, L_TOT - BASE - ACC), jnp.float32)

    # ---- block1: conv -> BN ; block2: residual add + ReLU ----
    z = batchnorm(conv(hf_ref, w1_ref), g1_ref, be1_ref)
    y = jnp.maximum(z + xf_ref[:, BASE:BASE + ACC], 0.0)

    # ---- extract each image's (contiguous) interior block to the output ----
    hf_ref[:, BASE:BASE + ACC] = y        # reuse scratch so extraction is a plain ref slice
    for n in range(N):
        start = BASE + n * S + P * W
        out_ref[n, :, :] = hf_ref[:, start:start + HW]


def resblock2d_forward(x_nchw, params):
    """x_nchw: (N, C, H, W) float32 (PyTorch layout). Returns (N, C, H, W).

    params = (w0, b0, g0, be0, w1, b1, g1, be1).  The conv biases b0/b1 are
    accepted but unused: under training-mode BatchNorm they are exactly
    cancelled by the batch-mean subtraction.
    """
    w0, b0, g0, be0, w1, b1, g1, be1 = params
    N, C, H, W = x_nchw.shape
    K = w0.shape[-1]
    P = K // 2
    eps = 1e-5

    R = H + 2 * P                         # padded rows per image
    S = R * W                             # flat padded length per image
    ACC = _round_up(N * S, 128)           # lane-dense compute width
    MAXOFF = P * W + P                    # largest |tap offset| in the flat layout
    BASE = MAXOFF                         # leading guard inside the padded-flat scratch
    L_TOT = _round_up(BASE + ACC + MAXOFF, 128)

    # -- tiny host-side constants: per-tap weight matrices and lane masks --
    # PyTorch conv weight (C_out, C_in, K, K) -> (tap, C_out, C_in), tap = kh*K + kw
    w0t = jnp.transpose(w0, (2, 3, 0, 1)).reshape(K * K, C, C).astype(jnp.float32)
    w1t = jnp.transpose(w1, (2, 3, 0, 1)).reshape(K * K, C, C).astype(jnp.float32)

    p = np.arange(ACC)
    col = p % W
    row = (p // W) % R
    masks = np.ones((K + 1, ACC), np.float32)
    for dw in range(-P, P + 1):
        if dw > 0:
            masks[P + dw] = (col < (W - dw)).astype(np.float32)
        elif dw < 0:
            masks[P + dw] = (col >= (-dw)).astype(np.float32)
    masks[K] = ((p < N * S) & (row >= P) & (row < P + H)).astype(np.float32)
    masks = jnp.asarray(masks)

    x_in = x_nchw.reshape(N, C, H * W).astype(jnp.float32)   # free reshape; no transpose / pad
    g0c = g0.reshape(C, 1).astype(jnp.float32)
    be0c = be0.reshape(C, 1).astype(jnp.float32)
    g1c = g1.reshape(C, 1).astype(jnp.float32)
    be1c = be1.reshape(C, 1).astype(jnp.float32)

    kern = functools.partial(_resblock2d_kernel, N=N, C=C, H=H, W=W, K=K,
                             BASE=BASE, ACC=ACC, L_TOT=L_TOT, eps=eps)
    vmem = pl.BlockSpec(memory_space=pltpu.MemorySpace.VMEM)

    # TODO(synk): for large N*C*H*W this whole-array-in-VMEM design should become a
    # gridded two-pass BN (per-tile stats then normalize) with BlockSpec pipelining
    # and a "parallel" batch axis; the single-invocation form targets small shapes.
    out = pl.pallas_call(
        kern,
        out_shape=jax.ShapeDtypeStruct((N, C, H * W), jnp.float32),
        in_specs=[vmem] * 8,
        out_specs=vmem,
        scratch_shapes=[pltpu.VMEM((C, L_TOT), jnp.float32),
                        pltpu.VMEM((C, L_TOT), jnp.float32)],
    )(x_in, w0t, w1t, masks, g0c, be0c, g1c, be1c)

    return out.reshape(N, C, H, W)


def resblock2d_reference(x, params):
    """Pure-JAX reference matching the PyTorch forward (training-mode BN)."""
    w0, b0, g0, be0, w1, b1, g1, be1 = params
    eps = 1e-5
    K = w0.shape[-1]
    P = K // 2

    def conv(x, w, b):
        y = jax.lax.conv_general_dilated(
            x, w, window_strides=(1, 1), padding=((P, P), (P, P)),
            dimension_numbers=('NCHW', 'OIHW', 'NCHW'))
        return y + b[None, :, None, None]

    def bn(y, g, be):
        mean = jnp.mean(y, axis=(0, 2, 3), keepdims=True)
        var = jnp.mean((y - mean) ** 2, axis=(0, 2, 3), keepdims=True)
        return (y - mean) * jax.lax.rsqrt(var + eps) * g[None, :, None, None] \
            + be[None, :, None, None]

    h = jax.nn.relu(bn(conv(x, w0, b0), g0, be0))
    h = bn(conv(h, w1, b1), g1, be1)
    return jax.nn.relu(h + x)


if __name__ == "__main__":
    N, C, H, W, K = 2, 4, 16, 16, 3

    key = jax.random.PRNGKey(0)
    k_x, k_w0, k_b0, k_w1, k_b1 = jax.random.split(key, 5)

    x = jax.random.normal(k_x, (N, C, H, W), jnp.float32)
    # deterministic synthetic parameters (shapes from ResBlock2d.__init__, n_out=C)
    w0 = 0.1 * jax.random.normal(k_w0, (C, C, K, K), jnp.float32)
    b0 = 0.1 * jax.random.normal(k_b0, (C,), jnp.float32)
    w1 = 0.1 * jax.random.normal(k_w1, (C, C, K, K), jnp.float32)
    b1 = 0.1 * jax.random.normal(k_b1, (C,), jnp.float32)
    g0 = jnp.ones((C,), jnp.float32)    # BatchNorm2d default affine init
    be0 = jnp.zeros((C,), jnp.float32)
    g1 = jnp.ones((C,), jnp.float32)
    be1 = jnp.zeros((C,), jnp.float32)
    params = (w0, b0, g0, be0, w1, b1, g1, be1)

    out = resblock2d_forward(x, params)
    out = jax.block_until_ready(out)

    ref = resblock2d_reference(x, params)
    assert out.shape == (N, C, H, W)
    assert jnp.allclose(out, ref, atol=1e-3, rtol=1e-3), float(jnp.max(jnp.abs(out - ref)))

    print("KERNEL_OK")
</pallas_src>

<mosaic_0001>
module attributes {stable_mosaic.version = 11 : i64} {
  func.func @_resblock2d_kernel(%arg0: memref<2x4x256xf32, #tpu.memory_space<vmem>>, %arg1: memref<9x4x4xf32, #tpu.memory_space<vmem>>, %arg2: memref<9x4x4xf32, #tpu.memory_space<vmem>>, %arg3: memref<4x640xf32, #tpu.memory_space<vmem>>, %arg4: memref<4x1xf32, #tpu.memory_space<vmem>>, %arg5: memref<4x1xf32, #tpu.memory_space<vmem>>, %arg6: memref<4x1xf32, #tpu.memory_space<vmem>>, %arg7: memref<4x1xf32, #tpu.memory_space<vmem>>, %arg8: memref<2x4x256xf32, #tpu.memory_space<vmem>>, %arg9: memref<4x768xf32, #tpu.memory_space<vmem>>, %arg10: memref<4x768xf32, #tpu.memory_space<vmem>>) attributes {dimension_semantics = [], scalar_prefetch = 0 : i64, scratch_operands = 2 : i64, tpu.core_type = #tpu.core_type<tc>} {
    %c3 = arith.constant 3 : index
    %c0 = arith.constant 0 : index
    %0 = vector.load %arg3[%c3, %c0] : memref<4x640xf32, #tpu.memory_space<vmem>>, vector<1x640xf32>
    %c0_0 = arith.constant 0 : index
    %c0_1 = arith.constant 0 : index
    %1 = vector.load %arg3[%c0_0, %c0_1] : memref<4x640xf32, #tpu.memory_space<vmem>>, vector<1x640xf32>
    %c2 = arith.constant 2 : index
    %c0_2 = arith.constant 0 : index
    %2 = vector.load %arg3[%c2, %c0_2] : memref<4x640xf32, #tpu.memory_space<vmem>>, vector<1x640xf32>
    %cst = arith.constant 0.000000e+00 : f32
    %3 = vector.broadcast %cst : f32 to vector<4x33xf32>
    %c0_3 = arith.constant 0 : index
    %c0_4 = arith.constant 0 : index
    %4 = vector.load %arg9[%c0_3, %c0_4] : memref<4x768xf32, #tpu.memory_space<vmem>>, vector<4x33xf32>
    tpu.vector_store %arg9[%c0_3, %c0_4], %3 {strides = array<i32>} : memref<4x768xf32, #tpu.memory_space<vmem>>, vector<4x33xf32>,
    %c0_5 = arith.constant 0 : index
    %c0_6 = arith.constant 0 : index
    %c0_7 = arith.constant 0 : index
    %5 = vector.load %arg0[%c0_5, %c0_6, %c0_7] : memref<2x4x256xf32, #tpu.memory_space<vmem>>, vector<1x4x256xf32>
    %6 = vector.shape_cast %5 : vector<1x4x256xf32> to vector<4x256xf32>
    %c0_8 = arith.constant 0 : index
    %c33 = arith.constant 33 : index
    %7 = vector.load %arg9[%c0_8, %c33] : memref<4x768xf32, #tpu.memory_space<vmem>>, vector<4x256xf32>
    tpu.vector_store %arg9[%c0_8, %c33], %6 {strides = array<i32>} : memref<4x768xf32, #tpu.memory_space<vmem>>, vector<4x256xf32>,
    %cst_9 = arith.constant 0.000000e+00 : f32
    %8 = vector.broadcast %cst_9 : f32 to vector<4x32xf32>
    %c0_10 = arith.constant 0 : index
    %c289 = arith.constant 289 : index
    %9 = vector.load %arg9[%c0_10, %c289] : memref<4x768xf32, #tpu.memory_space<vmem>>, vector<4x32xf32>
    tpu.vector_store %arg9[%c0_10, %c289], %8 {strides = array<i32>} : memref<4x768xf32, #tpu.memory_space<vmem>>, vector<4x32xf32>,
    %c1 = arith.constant 1 : index
    %c0_11 = arith.constant 0 : index
    %c0_12 = arith.constant 0 : index
    %10 = vector.load %arg0[%c1, %c0_11, %c0_12] : memref<2x4x256xf32, #tpu.memory_space<vmem>>, vector<1x4x256xf32>
    %11 = vector.shape_cast %10 : vector<1x4x256xf32> to vector<4x256xf32>
    %c0_13 = arith.constant 0 : index
    %c321 = arith.constant 321 : index
    %12 = vector.load %arg9[%c0_13, %c321] : memref<4x768xf32, #tpu.memory_space<vmem>>, vector<4x256xf32>
    tpu.vector_store %arg9[%c0_13, %c321], %11 {strides = array<i32>} : memref<4x768xf32, #tpu.memory_space<vmem>>, vector<4x256xf32>,
    %cst_14 = arith.constant 0.000000e+00 : f32
    %13 = vector.broadcast %cst_14 : f32 to vector<4x191xf32>
    %c0_15 = arith.constant 0 : index
    %c577 = arith.constant 577 : index
    %14 = vector.load %arg9[%c0_15, %c577] : memref<4x768xf32, #tpu.memory_space<vmem>>, vector<4x191xf32>
    tpu.vector_store %arg9[%c0_15, %c577], %13 {strides = array<i32>} : memref<4x768xf32, #tpu.memory_space<vmem>>, vector<4x191xf32>,
    %cst_16 = arith.constant 0.000000e+00 : f32
    %15 = vector.broadcast %cst_16 : f32 to vector<4x640xf32>
    %c0_17 = arith.constant 0 : index
    %c0_18 = arith.constant 0 : index
    %16 = vector.load %arg9[%c0_17, %c0_18] : memref<4x768xf32, #tpu.memory_space<vmem>>, vector<4x640xf32>
    %17 = vector.broadcast %1 : vector<1x640xf32> to vector<4x640xf32>
    %18 = arith.mulf %16, %17 : vector<4x640xf32>
    %c0_19 = arith.constant 0 : index
    %c0_20 = arith.constant 0 : index
    %c0_21 = arith.constant 0 : index
    %19 = vector.load %arg1[%c0_19, %c0_20, %c0_21] : memref<9x4x4xf32, #tpu.memory_space<vmem>>, vector<1x4x4xf32>
    %20 = vector.shape_cast %19 : vector<1x4x4xf32> to vector<4x4xf32>
    %cst_22 = arith.constant dense<0.000000e+00> : vector<4x640xf32>
    %21 = tpu.matmul %20, %18, %cst_22 {dimension_numbers = #tpu.dot_dimension_numbers<[1], [0], [0], [1], [0, 0, 1, 1], [], []>} : vector<4x4xf32>, vector<4x640xf32>, vector<4x640xf32> -> vector<4x640xf32>
    %22 = arith.addf %15, %21 : vector<4x640xf32>
    %c0_23 = arith.constant 0 : index
    %c1_24 = arith.constant 1 : index
    %23 = vector.load %arg9[%c0_23, %c1_24] : memref<4x768xf32, #tpu.memory_space<vmem>>, vector<4x640xf32>
    %c1_25 = arith.constant 1 : index
    %c0_26 = arith.constant 0 : index
    %c0_27 = arith.constant 0 : index
    %24 = vector.load %arg1[%c1_25, %c0_26, %c0_27] : memref<9x4x4xf32, #tpu.memory_space<vmem>>, vector<1x4x4xf32>
    %25 = vector.shape_cast %24 : vector<1x4x4xf32> to vector<4x4xf32>
    %cst_28 = arith.constant dense<0.000000e+00> : vector<4x640xf32>
    %26 = tpu.matmul %25, %23, %cst_28 {dimension_numbers = #tpu.dot_dimension_numbers<[1], [0], [0], [1], [0, 0, 1, 1], [], []>} : vector<4x4xf32>, vector<4x640xf32>, vector<4x640xf32> -> vector<4x640xf32>
    %27 = arith.addf %22, %26 : vector<4x640xf32>
    %c0_29 = arith.constant 0 : index
    %c2_30 = arith.constant 2 : index
    %28 = vector.load %arg9[%c0_29, %c2_30] : memref<4x768xf32, #tpu.memory_space<vmem>>, vector<4x640xf32>
    %29 = vector.broadcast %2 : vector<1x640xf32> to vector<4x640xf32>
    %30 = arith.mulf %28, %29 : vector<4x640xf32>
    %c2_31 = arith.constant 2 : index
    %c0_32 = arith.constant 0 : index
    %c0_33 = arith.constant 0 : index
    %31 = vector.load %arg1[%c2_31, %c0_32, %c0_33] : memref<9x4x4xf32, #tpu.memory_space<vmem>>, vector<1x4x4xf32>
    %32 = vector.shape_cast %31 : vector<1x4x4xf32> to vector<4x4xf32>
    %cst_34 = arith.constant dense<0.000000e+00> : vector<4x640xf32>
    %33 = tpu.matmul %32, %30, %cst_34 {dimension_numbers = #tpu.dot_dimension_numbers<[1], [0], [0], [1], [0, 0, 1, 1], [], []>} : vector<4x4xf32>, vector<4x640xf32>, vector<4x640xf32> -> vector<4x640xf32>
    %34 = arith.addf %27, %33 : vector<4x640xf32>
    %c0_35 = arith.constant 0 : index
    %c16 = arith.constant 16 : index
    %35 = vector.load %arg9[%c0_35, %c16] : memref<4x768xf32, #tpu.memory_space<vmem>>, vector<4x640xf32>
    %36 = vector.broadcast %1 : vector<1x640xf32> to vector<4x640xf32>
    %37 = arith.mulf %35, %36 : vector<4x640xf32>
    %c3_36 = arith.constant 3 : index
    %c0_37 = arith.constant 0 : index
    %c0_38 = arith.constant 0 : index
    %38 = vector.load %arg1[%c3_36, %c0_37, %c0_38] : memref<9x4x4xf32, #tpu.memory_space<vmem>>, vector<1x4x4xf32>
    %39 = vector.shape_cast %38 : vector<1x4x4xf32> to vector<4x4xf32>
    %cst_39 = arith.constant dense<0.000000e+00> : vector<4x640xf32>
    %40 = tpu.matmul %39, %37, %cst_39 {dimension_numbers = #tpu.dot_dimension_numbers<[1], [0], [0], [1], [0, 0, 1, 1], [], []>} : vector<4x4xf32>, vector<4x640xf32>, vector<4x640xf32> -> vector<4x640xf32>
    %41 = arith.addf %34, %40 : vector<4x640xf32>
    %c0_40 = arith.constant 0 : index
    %c17 = arith.constant 17 : index
    %42 = vector.load %arg9[%c0_40, %c17] : memref<4x768xf32, #tpu.memory_space<vmem>>, vector<4x640xf32>
    %c4 = arith.constant 4 : index
    %c0_41 = arith.constant 0 : index
    %c0_42 = arith.constant 0 : index
    %43 = vector.load %arg1[%c4, %c0_41, %c0_42] : memref<9x4x4xf32, #tpu.memory_space<vmem>>, vector<1x4x4xf32>
    %44 = vector.shape_cast %43 : vector<1x4x4xf32> to vector<4x4xf32>
    %cst_43 = arith.constant dense<0.000000e+00> : vector<4x640xf32>
    %45 = tpu.matmul %44, %42, %cst_43 {dimension_numbers = #tpu.dot_dimension_numbers<[1], [0], [0], [1], [0, 0, 1, 1], [], []>} : vector<4x4xf32>, vector<4x640xf32>, vector<4x640xf32> -> vector<4x640xf32>
    %46 = arith.addf %41, %45 : vector<4x640xf32>
    %c0_44 = arith.constant 0 : index
    %c18 = arith.constant 18 : index
    %47 = vector.load %arg9[%c0_44, %c18] : memref<4x768xf32, #tpu.memory_space<vmem>>, vector<4x640xf32>
    %48 = vector.broadcast %2 : vector<1x640xf32> to vector<4x640xf32>
    %49 = arith.mulf %47, %48 : vector<4x640xf32>
    %c5 = arith.constant 5 : index
    %c0_45 = arith.constant 0 : index
    %c0_46 = arith.constant 0 : index
    %50 = vector.load %arg1[%c5, %c0_45, %c0_46] : memref<9x4x4xf32, #tpu.memory_space<vmem>>, vector<1x4x4xf32>
    %51 = vector.shape_cast %50 : vector<1x4x4xf32> to vector<4x4xf32>
    %cst_47 = arith.constant dense<0.000000e+00> : vector<4x640xf32>
    %52 = tpu.matmul %51, %49, %cst_47 {dimension_numbers = #tpu.dot_dimension_numbers<[1], [0], [0], [1], [0, 0, 1, 1], [], []>} : vector<4x4xf32>, vector<4x640xf32>, vector<4x640xf32> -> vector<4x640xf32>
    %53 = arith.addf %46, %52 : vector<4x640xf32>
    %c0_48 = arith.constant 0 : index
    %c32 = arith.constant 32 : index
    %54 = vector.load %arg9[%c0_48, %c32] : memref<4x768xf32, #tpu.memory_space<vmem>>, vector<4x640xf32>
    %55 = vector.broadcast %1 : vector<1x640xf32> to vector<4x640xf32>
    %56 = arith.mulf %54, %55 : vector<4x640xf32>
    %c6 = arith.constant 6 : index
    %c0_49 = arith.constant 0 : index
    %c0_50 = arith.constant 0 : index
    %57 = vector.load %arg1[%c6, %c0_49, %c0_50] : memref<9x4x4xf32, #tpu.memory_space<vmem>>, vector<1x4x4xf32>
    %58 = vector.shape_cast %57 : vector<1x4x4xf32> to vector<4x4xf32>
    %cst_51 = arith.constant dense<0.000000e+00> : vector<4x640xf32>
    %59 = tpu.matmul %58, %56, %cst_51 {dimension_numbers = #tpu.dot_dimension_numbers<[1], [0], [0], [1], [0, 0, 1, 1], [], []>} : vector<4x4xf32>, vector<4x640xf32>, vector<4x640xf32> -> vector<4x640xf32>
    %60 = arith.addf %53, %59 : vector<4x640xf32>
    %c0_52 = arith.constant 0 : index
    %c33_53 = arith.constant 33 : index
    %61 = vector.load %arg9[%c0_52, %c33_53] : memref<4x768xf32, #tpu.memory_space<vmem>>, vector<4x640xf32>
    %c7 = arith.constant 7 : index
    %c0_54 = arith.constant 0 : index
    %c0_55 = arith.constant 0 : index
    %62 = vector.load %arg1[%c7, %c0_54, %c0_55] : memref<9x4x4xf32, #tpu.memory_space<vmem>>, vector<1x4x4xf32>
    %63 = vector.shape_cast %62 : vector<1x4x4xf32> to vector<4x4xf32>
    %cst_56 = arith.constant dense<0.000000e+00> : vector<4x640xf32>
    %64 = tpu.matmul %63, %61, %cst_56 {dimension_numbers = #tpu.dot_dimension_numbers<[1], [0], [0], [1], [0, 0, 1, 1], [], []>} : vector<4x4xf32>, vector<4x640xf32>, vector<4x640xf32> -> vector<4x640xf32>
    %65 = arith.addf %60, %64 : vector<4x640xf32>
    %c0_57 = arith.constant 0 : index
    %c34 = arith.constant 34 : index
    %66 = vector.load %arg9[%c0_57, %c34] : memref<4x768xf32, #tpu.memory_space<vmem>>, vector<4x640xf32>
    %67 = vector.broadcast %2 : vector<1x640xf32> to vector<4x640xf32>
    %68 = arith.mulf %66, %67 : vector<4x640xf32>
    %c8 = arith.constant 8 : index
    %c0_58 = arith.constant 0 : index
    %c0_59 = arith.constant 0 : index
    %69 = vector.load %arg1[%c8, %c0_58, %c0_59] : memref<9x4x4xf32, #tpu.memory_space<vmem>>, vector<1x4x4xf32>
    %70 = vector.shape_cast %69 : vector<1x4x4xf32> to vector<4x4xf32>
    %cst_60 = arith.constant dense<0.000000e+00> : vector<4x640xf32>
    %71 = tpu.matmul %70, %68, %cst_60 {dimension_numbers = #tpu.dot_dimension_numbers<[1], [0], [0], [1], [0, 0, 1, 1], [], []>} : vector<4x4xf32>, vector<4x640xf32>, vector<4x640xf32> -> vector<4x640xf32>
    %72 = arith.addf %65, %71 : vector<4x640xf32>
    %73 = vector.broadcast %0 : vector<1x640xf32> to vector<4x640xf32>
    %74 = arith.mulf %72, %73 : vector<4x640xf32>
    %cst_61 = arith.constant dense<0.000000e+00> : vector<4xf32>
    %75 = vector.multi_reduction <add>, %74, %cst_61 [1] : vector<4x640xf32> to vector<4xf32>
    %76 = vector.shape_cast %75 : vector<4xf32> to vector<4x1xf32>
    %77 = arith.mulf %74, %72 : vector<4x640xf32>
    %cst_62 = arith.constant dense<0.000000e+00> : vector<4xf32>
    %78 = vector.multi_reduction <add>, %77, %cst_62 [1] : vector<4x640xf32> to vector<4xf32>
    %79 = vector.shape_cast %78 : vector<4xf32> to vector<4x1xf32>
    %cst_63 = arith.constant 0.001953125 : f32
    %80 = vector.broadcast %cst_63 : f32 to vector<4x1xf32>
    %81 = arith.mulf %76, %80 : vector<4x1xf32>
    %cst_64 = arith.constant 0.001953125 : f32
    %82 = vector.broadcast %cst_64 : f32 to vector<4x1xf32>
    %83 = arith.mulf %79, %82 : vector<4x1xf32>
    %84 = arith.mulf %81, %81 : vector<4x1xf32>
    %85 = arith.subf %83, %84 : vector<4x1xf32>
    %cst_65 = arith.constant 9.99999974E-6 : f32
    %86 = vector.broadcast %cst_65 : f32 to vector<4x1xf32>
    %87 = arith.addf %85, %86 : vector<4x1xf32>
    %88 = math.rsqrt %87 : vector<4x1xf32>
    %c0_66 = arith.constant 0 : index
    %c0_67 = arith.constant 0 : index
    %89 = vector.load %arg4[%c0_66, %c0_67] : memref<4x1xf32, #tpu.memory_space<vmem>>, vector<4x1xf32>
    %90 = arith.mulf %88, %89 : vector<4x1xf32>
    %c0_68 = arith.constant 0 : index
    %c0_69 = arith.constant 0 : index
    %91 = vector.load %arg5[%c0_68, %c0_69] : memref<4x1xf32, #tpu.memory_space<vmem>>, vector<4x1xf32>
    %92 = arith.mulf %81, %90 : vector<4x1xf32>
    %93 = arith.subf %91, %92 : vector<4x1xf32>
    %94 = vector.broadcast %90 : vector<4x1xf32> to vector<4x640xf32>
    %95 = arith.mulf %72, %94 : vector<4x640xf32>
    %96 = vector.broadcast %93 : vector<4x1xf32> to vector<4x640xf32>
    %97 = arith.addf %95, %96 : vector<4x640xf32>
    %cst_70 = arith.constant 0.000000e+00 : f32
    %98 = vector.broadcast %cst_70 : f32 to vector<4x640xf32>
    %99 = arith.maximumf %97, %98 : vector<4x640xf32>
    %100 = vector.broadcast %0 : vector<1x640xf32> to vector<4x640xf32>
    %101 = arith.mulf %99, %100 : vector<4x640xf32>
    %cst_71 = arith.constant 0.000000e+00 : f32
    %102 = vector.broadcast %cst_71 : f32 to vector<4x17xf32>
    %c0_72 = arith.constant 0 : index
    %c0_73 = arith.constant 0 : index
    %103 = vector.load %arg10[%c0_72, %c0_73] : memref<4x768xf32, #tpu.memory_space<vmem>>, vector<4x17xf32>
    tpu.vector_store %arg10[%c0_72, %c0_73], %102 {strides = array<i32>} : memref<4x768xf32, #tpu.memory_space<vmem>>, vector<4x17xf32>,
    %c0_74 = arith.constant 0 : index
    %c17_75 = arith.constant 17 : index
    %104 = vector.load %arg10[%c0_74, %c17_75] : memref<4x768xf32, #tpu.memory_space<vmem>>, vector<4x640xf32>
    tpu.vector_store %arg10[%c0_74, %c17_75], %101 {strides = array<i32>} : memref<4x768xf32, #tpu.memory_space<vmem>>, vector<4x640xf32>,
    %cst_76 = arith.constant 0.000000e+00 : f32
    %105 = vector.broadcast %cst_76 : f32 to vector<4x111xf32>
    %c0_77 = arith.constant 0 : index
    %c657 = arith.constant 657 : index
    %106 = vector.load %arg10[%c0_77, %c657] : memref<4x768xf32, #tpu.memory_space<vmem>>, vector<4x111xf32>
    tpu.vector_store %arg10[%c0_77, %c657], %105 {strides = array<i32>} : memref<4x768xf32, #tpu.memory_space<vmem>>, vector<4x111xf32>,
    %cst_78 = arith.constant 0.000000e+00 : f32
    %107 = vector.broadcast %cst_78 : f32 to vector<4x640xf32>
    %c0_79 = arith.constant 0 : index
    %c0_80 = arith.constant 0 : index
    %108 = vector.load %arg10[%c0_79, %c0_80] : memref<4x768xf32, #tpu.memory_space<vmem>>, vector<4x640xf32>
    %109 = vector.broadcast %1 : vector<1x640xf32> to vector<4x640xf32>
    %110 = arith.mulf %108, %109 : vector<4x640xf32>
    %c0_81 = arith.constant 0 : index
    %c0_82 = arith.constant 0 : index
    %c0_83 = arith.constant 0 : index
    %111 = vector.load %arg2[%c0_81, %c0_82, %c0_83] : memref<9x4x4xf32, #tpu.memory_space<vmem>>, vector<1x4x4xf32>
    %112 = vector.shape_cast %111 : vector<1x4x4xf32> to vector<4x4xf32>
    %cst_84 = arith.constant dense<0.000000e+00> : vector<4x640xf32>
    %113 = tpu.matmul %112, %110, %cst_84 {dimension_numbers = #tpu.dot_dimension_numbers<[1], [0], [0], [1], [0, 0, 1, 1], [], []>} : vector<4x4xf32>, vector<4x640xf32>, vector<4x640xf32> -> vector<4x640xf32>
    %114 = arith.addf %107, %113 : vector<4x640xf32>
    %c0_85 = arith.constant 0 : index
    %c1_86 = arith.constant 1 : index
    %115 = vector.load %arg10[%c0_85, %c1_86] : memref<4x768xf32, #tpu.memory_space<vmem>>, vector<4x640xf32>
    %c1_87 = arith.constant 1 : index
    %c0_88 = arith.constant 0 : index
    %c0_89 = arith.constant 0 : index
    %116 = vector.load %arg2[%c1_87, %c0_88, %c0_89] : memref<9x4x4xf32, #tpu.memory_space<vmem>>, vector<1x4x4xf32>
    %117 = vector.shape_cast %116 : vector<1x4x4xf32> to vector<4x4xf32>
    %cst_90 = arith.constant dense<0.000000e+00> : vector<4x640xf32>
    %118 = tpu.matmul %117, %115, %cst_90 {dimension_numbers = #tpu.dot_dimension_numbers<[1], [0], [0], [1], [0, 0, 1, 1], [], []>} : vector<4x4xf32>, vector<4x640xf32>, vector<4x640xf32> -> vector<4x640xf32>
    %119 = arith.addf %114, %118 : vector<4x640xf32>
    %c0_91 = arith.constant 0 : index
    %c2_92 = arith.constant 2 : index
    %120 = vector.load %arg10[%c0_91, %c2_92] : memref<4x768xf32, #tpu.memory_space<vmem>>, vector<4x640xf32>
    %121 = vector.broadcast %2 : vector<1x640xf32> to vector<4x640xf32>
    %122 = arith.mulf %120, %121 : vector<4x640xf32>
    %c2_93 = arith.constant 2 : index
    %c0_94 = arith.constant 0 : index
    %c0_95 = arith.constant 0 : index
    %123 = vector.load %arg2[%c2_93, %c0_94, %c0_95] : memref<9x4x4xf32, #tpu.memory_space<vmem>>, vector<1x4x4xf32>
    %124 = vector.shape_cast %123 : vector<1x4x4xf32> to vector<4x4xf32>
    %cst_96 = arith.constant dense<0.000000e+00> : vector<4x640xf32>
    %125 = tpu.matmul %124, %122, %cst_96 {dimension_numbers = #tpu.dot_dimension_numbers<[1], [0], [0], [1], [0, 0, 1, 1], [], []>} : vector<4x4xf32>, vector<4x640xf32>, vector<4x640xf32> -> vector<4x640xf32>
    %126 = arith.addf %119, %125 : vector<4x640xf32>
    %c0_97 = arith.constant 0 : index
    %c16_98 = arith.constant 16 : index
    %127 = vector.load %arg10[%c0_97, %c16_98] : memref<4x768xf32, #tpu.memory_space<vmem>>, vector<4x640xf32>
    %128 = vector.broadcast %1 : vector<1x640xf32> to vector<4x640xf32>
    %129 = arith.mulf %127, %128 : vector<4x640xf32>
    %c3_99 = arith.constant 3 : index
    %c0_100 = arith.constant 0 : index
    %c0_101 = arith.constant 0 : index
    %130 = vector.load %arg2[%c3_99, %c0_100, %c0_101] : memref<9x4x4xf32, #tpu.memory_space<vmem>>, vector<1x4x4xf32>
    %131 = vector.shape_cast %130 : vector<1x4x4xf32> to vector<4x4xf32>
    %cst_102 = arith.constant dense<0.000000e+00> : vector<4x640xf32>
    %132 = tpu.matmul %131, %129, %cst_102 {dimension_numbers = #tpu.dot_dimension_numbers<[1], [0], [0], [1], [0, 0, 1, 1], [], []>} : vector<4x4xf32>, vector<4x640xf32>, vector<4x640xf32> -> vector<4x640xf32>
    %133 = arith.addf %126, %132 : vector<4x640xf32>
    %c0_103 = arith.constant 0 : index
    %c17_104 = arith.constant 17 : index
    %134 = vector.load %arg10[%c0_103, %c17_104] : memref<4x768xf32, #tpu.memory_space<vmem>>, vector<4x640xf32>
    %c4_105 = arith.constant 4 : index
    %c0_106 = arith.constant 0 : index
    %c0_107 = arith.constant 0 : index
    %135 = vector.load %arg2[%c4_105, %c0_106, %c0_107] : memref<9x4x4xf32, #tpu.memory_space<vmem>>, vector<1x4x4xf32>
    %136 = vector.shape_cast %135 : vector<1x4x4xf32> to vector<4x4xf32>
    %cst_108 = arith.constant dense<0.000000e+00> : vector<4x640xf32>
    %137 = tpu.matmul %136, %134, %cst_108 {dimension_numbers = #tpu.dot_dimension_numbers<[1], [0], [0], [1], [0, 0, 1, 1], [], []>} : vector<4x4xf32>, vector<4x640xf32>, vector<4x640xf32> -> vector<4x640xf32>
    %138 = arith.addf %133, %137 : vector<4x640xf32>
    %c0_109 = arith.constant 0 : index
    %c18_110 = arith.constant 18 : index
    %139 = vector.load %arg10[%c0_109, %c18_110] : memref<4x768xf32, #tpu.memory_space<vmem>>, vector<4x640xf32>
    %140 = vector.broadcast %2 : vector<1x640xf32> to vector<4x640xf32>
    %141 = arith.mulf %139, %140 : vector<4x640xf32>
    %c5_111 = arith.constant 5 : index
    %c0_112 = arith.constant 0 : index
    %c0_113 = arith.constant 0 : index
    %142 = vector.load %arg2[%c5_111, %c0_112, %c0_113] : memref<9x4x4xf32, #tpu.memory_space<vmem>>, vector<1x4x4xf32>
    %143 = vector.shape_cast %142 : vector<1x4x4xf32> to vector<4x4xf32>
    %cst_114 = arith.constant dense<0.000000e+00> : vector<4x640xf32>
    %144 = tpu.matmul %143, %141, %cst_114 {dimension_numbers = #tpu.dot_dimension_numbers<[1], [0], [0], [1], [0, 0, 1, 1], [], []>} : vector<4x4xf32>, vector<4x640xf32>, vector<4x640xf32> -> vector<4x640xf32>
    %145 = arith.addf %138, %144 : vector<4x640xf32>
    %c0_115 = arith.constant 0 : index
    %c32_116 = arith.constant 32 : index
    %146 = vector.load %arg10[%c0_115, %c32_116] : memref<4x768xf32, #tpu.memory_space<vmem>>, vector<4x640xf32>
    %147 = vector.broadcast %1 : vector<1x640xf32> to vector<4x640xf32>
    %148 = arith.mulf %146, %147 : vector<4x640xf32>
    %c6_117 = arith.constant 6 : index
    %c0_118 = arith.constant 0 : index
    %c0_119 = arith.constant 0 : index
    %149 = vector.load %arg2[%c6_117, %c0_118, %c0_119] : memref<9x4x4xf32, #tpu.memory_space<vmem>>, vector<1x4x4xf32>
    %150 = vector.shape_cast %149 : vector<1x4x4xf32> to vector<4x4xf32>
    %cst_120 = arith.constant dense<0.000000e+00> : vector<4x640xf32>
    %151 = tpu.matmul %150, %148, %cst_120 {dimension_numbers = #tpu.dot_dimension_numbers<[1], [0], [0], [1], [0, 0, 1, 1], [], []>} : vector<4x4xf32>, vector<4x640xf32>, vector<4x640xf32> -> vector<4x640xf32>
    %152 = arith.addf %145, %151 : vector<4x640xf32>
    %c0_121 = arith.constant 0 : index
    %c33_122 = arith.constant 33 : index
    %153 = vector.load %arg10[%c0_121, %c33_122] : memref<4x768xf32, #tpu.memory_space<vmem>>, vector<4x640xf32>
    %c7_123 = arith.constant 7 : index
    %c0_124 = arith.constant 0 : index
    %c0_125 = arith.constant 0 : index
    %154 = vector.load %arg2[%c7_123, %c0_124, %c0_125] : memref<9x4x4xf32, #tpu.memory_space<vmem>>, vector<1x4x4xf32>
    %155 = vector.shape_cast %154 : vector<1x4x4xf32> to vector<4x4xf32>
    %cst_126 = arith.constant dense<0.000000e+00> : vector<4x640xf32>
    %156 = tpu.matmul %155, %153, %cst_126 {dimension_numbers = #tpu.dot_dimension_numbers<[1], [0], [0], [1], [0, 0, 1, 1], [], []>} : vector<4x4xf32>, vector<4x640xf32>, vector<4x640xf32> -> vector<4x640xf32>
    %157 = arith.addf %152, %156 : vector<4x640xf32>
    %c0_127 = arith.constant 0 : index
    %c34_128 = arith.constant 34 : index
    %158 = vector.load %arg10[%c0_127, %c34_128] : memref<4x768xf32, #tpu.memory_space<vmem>>, vector<4x640xf32>
    %159 = vector.broadcast %2 : vector<1x640xf32> to vector<4x640xf32>
    %160 = arith.mulf %158, %159 : vector<4x640xf32>
    %c8_129 = arith.constant 8 : index
    %c0_130 = arith.constant 0 : index
    %c0_131 = arith.constant 0 : index
    %161 = vector.load %arg2[%c8_129, %c0_130, %c0_131] : memref<9x4x4xf32, #tpu.memory_space<vmem>>, vector<1x4x4xf32>
    %162 = vector.shape_cast %161 : vector<1x4x4xf32> to vector<4x4xf32>
    %cst_132 = arith.constant dense<0.000000e+00> : vector<4x640xf32>
    %163 = tpu.matmul %162, %160, %cst_132 {dimension_numbers = #tpu.dot_dimension_numbers<[1], [0], [0], [1], [0, 0, 1, 1], [], []>} : vector<4x4xf32>, vector<4x640xf32>, vector<4x640xf32> -> vector<4x640xf32>
    %164 = arith.addf %157, %163 : vector<4x640xf32>
    %165 = vector.broadcast %0 : vector<1x640xf32> to vector<4x640xf32>
    %166 = arith.mulf %164, %165 : vector<4x640xf32>
    %cst_133 = arith.constant dense<0.000000e+00> : vector<4xf32>
    %167 = vector.multi_reduction <add>, %166, %cst_133 [1] : vector<4x640xf32> to vector<4xf32>
    %168 = vector.shape_cast %167 : vector<4xf32> to vector<4x1xf32>
    %169 = arith.mulf %166, %164 : vector<4x640xf32>
    %cst_134 = arith.constant dense<0.000000e+00> : vector<4xf32>
    %170 = vector.multi_reduction <add>, %169, %cst_134 [1] : vector<4x640xf32> to vector<4xf32>
    %171 = vector.shape_cast %170 : vector<4xf32> to vector<4x1xf32>
    %cst_135 = arith.constant 0.001953125 : f32
    %172 = vector.broadcast %cst_135 : f32 to vector<4x1xf32>
    %173 = arith.mulf %168, %172 : vector<4x1xf32>
    %cst_136 = arith.constant 0.001953125 : f32
    %174 = vector.broadcast %cst_136 : f32 to vector<4x1xf32>
    %175 = arith.mulf %171, %174 : vector<4x1xf32>
    %176 = arith.mulf %173, %173 : vector<4x1xf32>
    %177 = arith.subf %175, %176 : vector<4x1xf32>
    %cst_137 = arith.constant 9.99999974E-6 : f32
    %178 = vector.broadcast %cst_137 : f32 to vector<4x1xf32>
    %179 = arith.addf %177, %178 : vector<4x1xf32>
    %180 = math.rsqrt %179 : vector<4x1xf32>
    %c0_138 = arith.constant 0 : index
    %c0_139 = arith.constant 0 : index
    %181 = vector.load %arg6[%c0_138, %c0_139] : memref<4x1xf32, #tpu.memory_space<vmem>>, vector<4x1xf32>
    %182 = arith.mulf %180, %181 : vector<4x1xf32>
    %c0_140 = arith.constant 0 : index
    %c0_141 = arith.constant 0 : index
    %183 = vector.load %arg7[%c0_140, %c0_141] : memref<4x1xf32, #tpu.memory_space<vmem>>, vector<4x1xf32>
    %184 = arith.mulf %173, %182 : vector<4x1xf32>
    %185 = arith.subf %183, %184 : vector<4x1xf32>
    %186 = vector.broadcast %182 : vector<4x1xf32> to vector<4x640xf32>
    %187 = arith.mulf %164, %186 : vector<4x640xf32>
    %188 = vector.broadcast %185 : vector<4x1xf32> to vector<4x640xf32>
    %189 = arith.addf %187, %188 : vector<4x640xf32>
    %c0_142 = arith.constant 0 : index
    %c17_143 = arith.constant 17 : index
    %190 = vector.load %arg9[%c0_142, %c17_143] : memref<4x768xf32, #tpu.memory_space<vmem>>, vector<4x640xf32>
    %191 = arith.addf %189, %190 : vector<4x640xf32>
    %cst_144 = arith.constant 0.000000e+00 : f32
    %192 = vector.broadcast %cst_144 : f32 to vector<4x640xf32>
    %193 = arith.maximumf %191, %192 : vector<4x640xf32>
    %c0_145 = arith.constant 0 : index
    %c17_146 = arith.constant 17 : index
    %194 = vector.load %arg10[%c0_145, %c17_146] : memref<4x768xf32, #tpu.memory_space<vmem>>, vector<4x640xf32>
    tpu.vector_store %arg10[%c0_145, %c17_146], %193 {strides = array<i32>} : memref<4x768xf32, #tpu.memory_space<vmem>>, vector<4x640xf32>,
    %c0_147 = arith.constant 0 : index
    %c33_148 = arith.constant 33 : index
    %195 = vector.load %arg10[%c0_147, %c33_148] : memref<4x768xf32, #tpu.memory_space<vmem>>, vector<4x256xf32>
    %c0_149 = arith.constant 0 : index
    %c0_150 = arith.constant 0 : index
    %c0_151 = arith.constant 0 : index
    %196 = vector.load %arg8[%c0_149, %c0_150, %c0_151] : memref<2x4x256xf32, #tpu.memory_space<vmem>>, vector<1x4x256xf32>
    %197 = vector.shape_cast %196 : vector<1x4x256xf32> to vector<4x256xf32>
    %198 = vector.shape_cast %195 : vector<4x256xf32> to vector<1x4x256xf32>
    tpu.vector_store %arg8[%c0_149, %c0_150, %c0_151], %198 {strides = array<i32>} : memref<2x4x256xf32, #tpu.memory_space<vmem>>, vector<1x4x256xf32>,
    %c0_152 = arith.constant 0 : index
    %c321_153 = arith.constant 321 : index
    %199 = vector.load %arg10[%c0_152, %c321_153] : memref<4x768xf32, #tpu.memory_space<vmem>>, vector<4x256xf32>
    %c1_154 = arith.constant 1 : index
    %c0_155 = arith.constant 0 : index
    %c0_156 = arith.constant 0 : index
    %200 = vector.load %arg8[%c1_154, %c0_155, %c0_156] : memref<2x4x256xf32, #tpu.memory_space<vmem>>, vector<1x4x256xf32>
    %201 = vector.shape_cast %200 : vector<1x4x256xf32> to vector<4x256xf32>
    %202 = vector.shape_cast %199 : vector<4x256xf32> to vector<1x4x256xf32>
    tpu.vector_store %arg8[%c1_154, %c0_155, %c0_156], %202 {strides = array<i32>} : memref<2x4x256xf32, #tpu.memory_space<vmem>>, vector<1x4x256xf32>,
    return
  }
}

</mosaic_0001>

<bundles_post_ra>
// kernel: tpu_custom_call.1
= control target key start
LH: loop header
LB: loop body
LE: loop exit
PB: predicated region body
PF: predicated region fallthrough
CT: control target
= control target key end

     0   :  { %v73_v1 = vlaneseq  ;;  %s5499_s29 = smov 33   ;;  %vm35_vm0 = vcmask 265216   ;;  %v6539_v10 = vmov 0.0   ;;  %s6530_s0 = inlined_call_operand.vmem [shape: f32[2,4,256], index: 0, kind: input, shape index: {}]   ;;  %s6531_s1 = inlined_call_operand.vmem [shape: f32[9,4,4], index: 1, kind: input, shape index: {}]   ;;  %s6532_s2 = inlined_call_operand.vmem [shape: f32[9,4,4], index: 2, kind: input, shape index: {}]   ;;  %s6533_s3 = inlined_call_operand.vmem [shape: f32[4,640], index: 3, kind: input, shape index: {}]   ;;  %s6534_s4 = inlined_call_operand.vmem [shape: f32[4,1], index: 4, kind: input, shape index: {}]   ;;  %s6535_s5 = inlined_call_operand.vmem [shape: f32[4,1], index: 5, kind: input, shape index: {}]   ;;  %s6536_s6 = inlined_call_operand.vmem [shape: f32[4,1], index: 6, kind: input, shape index: {}]   ;;  %s6537_s7 = inlined_call_operand.vmem [shape: f32[4,1], index: 7, kind: input, shape index: {}]   ;;  %s6538_s8 = inlined_call_operand.hbm [shape: f32[2,4,256], index: 8, kind: output, shape index: {}]  }
   0x1   :  { %v37_v0 = vld [vmem:[%s6530_s0] sm:$0xff]  ;;  %v5153_v2 = vld [vmem:[%s6530_s0 + $0x8] sm:$0xff]  ;;  %36 = vst.msk [vmem:[#allocation2] sm:$0xf] %vm35_vm0, %v6539_v10  ;;  %210 = vmatprep.mubr.f32.mxu0 %v6539_v10  ;;  %281 = vmatprep.mubr.f32.mxu1 %v6539_v10 }
   0x2   :  { %39 = vrot.lane.b32.xlu0 %v37_v0, %s5499_s29  ;;  %v5152_v3 = vld [vmem:[%s6533_s3 + $0x2] ss:$4 sm:$0x1f]  ;;  %v74_v4 = vshrl.u32 %v73_v1, 7 }
   0x3   :  { %v32_v5 = vld [vmem:[%s6533_s3] ss:$4 sm:$0x1f] }
   0x4   :  { %v5579_v6 = vsub.s32 4, %v74_v4  ;;  %v5581_v7 = vsub.s32 0, %v74_v4  ;;  %v5583_v8 = vsub.s32 1, %v74_v4  ;;  %v5585_v9 = vsub.s32 2, %v74_v4 }
   0x5   :  { %13 = vsyncpa [#allocation5], 0  ;;  %s5501_s0 = smov 65   ;;  %v5591_v11 = vsub.s32 3, %v74_v4  ;;  %s5502_s14 = smov 2   ;;  %vm46_vm1 = vcmask 1043720  }
   0x6   :  { %56 = vrot.lane.b32.xlu0 %v5153_v2, %s5501_s0  ;;  %v611_v12 = vrot.slane %v5152_v3, %v5579_v6  ;;  %v595_v13 = vrot.slane %v5152_v3, %v5581_v7  ;;  %v599_v14 = vrot.slane %v5152_v3, %v5583_v8  ;;  %v84_v15 = vrot.slane %v32_v5, %v5585_v9  ;;  %s5503_s15 = smov 16   ;;  %s5504_s16 = smov 18  }
   0x7   :  { %v88_v16 = vrot.slane %v32_v5, %v5591_v11  ;;  %v603_v17 = vrot.slane %v5152_v3, %v5585_v9  ;;  %v607_v18 = vrot.slane %v5152_v3, %v5591_v11  ;;  %v76_v22 = vrot.slane %v32_v5, %v5581_v7  ;;  %s5505_s17 = smov 32   ;;  %s5506_s18 = smov 34  }
   0x8   :  { %v612_v19 = vcombine.low %v595_v13, %v599_v14  ;;  %v80_v23 = vrot.slane %v32_v5, %v5583_v8  ;;  %v5609_v25 = vrot.slane %v32_v5, %v5579_v6  ;;  %vm47_vm2 = vcmask 1047556   ;;  %s5507_s19 = smov 127   ;;  %s5508_s20 = smov 111  }
   0x9   :  { %v5600_v20 = vcombine.low %v84_v15, %v88_v16  ;;  %v613_v21 = vcombine.low %v603_v17, %v607_v18  ;;  %vm42_vm3 = vcmask 269312   ;;  %vm48_vm4 = vmor %vm47_vm2, %vm46_vm1  ;;  %vm51_vm5 = vcmask 527624   ;;  %s5509_s21 = smov 126   ;;  %s5510_s22 = smov 112  }
   0xa   :  { %618 = vrot.lane.b32.xlu0 %v611_v12, %s5502_s14  ;;  %614 = vrot.lane.b32.xlu1 %v612_v19, %s5502_s14  ;;  %v5605_v24 = vcombine.low %v76_v22, %v80_v23  ;;  %6553 = vst [vmem:[#allocation9_spill] sm:$0xff] %v5609_v25  ;;  %vm63_vm6 = vcmask 1043976   ;;  %vm59_vm7 = vcmask 531456   ;;  %vm66_vm8 = vcmask 527360   ;;  %s5511_s23 = smov 110   ;;  %s5512_s24 = smov 96  }
   0xb   :  { %6551 = vst [vmem:[#allocation7_spill] sm:$0xff] %v5600_v20  ;;  %vm64_vm9 = vmor %vm47_vm2, %vm63_vm6  ;;  %vm623_vm10 = vcmask 15360   ;;  %vm135_vm11 = vcmask 1043456   ;;  %vm903_vm12 = vcmask 130048   ;;  %vm1442_vm13 = vcmask 146432   ;;  %s5513_s25 = smov 95  }
   0xc   :  { %6552 = vst [vmem:[#allocation8_spill] sm:$0xff] %v5605_v24  ;;  %vm1722_vm14 = vcmask 261120   ;;  %vm2261_vm15 = vcmask 277504   ;;  %s5514_s26 = smov 94   ;;  %vm131_vm1 = vcmask 31744   ;;  %vm1194_vm6 = vcmask 908288  }
   0xe   :  { %896 = vrot.lane.b32.xlu0 %v5600_v20, %s5503_s15  ;;  %616 = vrot.lane.b32.xlu1 %v613_v21, %s5502_s14 }
  0x12   :  { %1433 = vrot.lane.b32.xlu0 %v612_v19, %s5504_s16  ;;  %894 = vrot.lane.b32.xlu1 %v5605_v24, %s5503_s15 }
  0x16   :  { %1437 = vrot.lane.b32.xlu0 %v611_v12, %s5504_s16  ;;  %898 = vrot.lane.b32.xlu1 %v5609_v25, %s5503_s15 }
  0x1a   :  { %1715 = vrot.lane.b32.xlu0 %v5600_v20, %s5505_s17  ;;  %1435 = vrot.lane.b32.xlu1 %v613_v21, %s5504_s16 }
  0x1e   :  { %2252 = vrot.lane.b32.xlu0 %v612_v19, %s5506_s18  ;;  %1713 = vrot.lane.b32.xlu1 %v5605_v24, %s5505_s17 }
  0x22   :  { %2256 = vrot.lane.b32.xlu0 %v611_v12, %s5506_s18  ;;  %1717 = vrot.lane.b32.xlu1 %v5609_v25, %s5505_s17 }
  0x26   :  { %2254 = vrot.lane.b32.xlu1 %v613_v21, %s5506_s18 }
  0x74   :  { %v40_v26 = vpop.permute.xlu0 %39 }
  0x75   :  { %v41_v27 = vrot.slane %v40_v26, 4 }
  0x77   :  { %v43_v28 = vsel %vm42_vm3, %v41_v27, %v40_v26  ;;  %50 = vst.msk [vmem:[#allocation2 + $0x8] sm:$0xf] %vm35_vm0, %v41_v27  ;;  %vm125_vm0 = vcmask 1039360   ;;  %vm5515_vm3 = vmmov 0  }
  0x78   :  { %49 = vst.msk [vmem:[#allocation2] sm:$0xff] %vm48_vm4, %v43_v28  ;;  %v57_v29 = vpop.permute.xlu0 %56  ;;  %vm655_vm4 = vcmask 1031168  }
  0x79   :  { %52 = vst.msk [vmem:[#allocation2 + $0x8] sm:$0xf] %vm51_vm5, %v6539_v10  ;;  %v58_v30 = vrot.slane %v57_v29, 4  ;;  %vm935_vm5 = vcmask 916480  }
  0x7b   :  { %v60_v31 = vsel %vm59_vm7, %v58_v30, %v57_v29  ;;  %67 = vst.msk [vmem:[#allocation2 + $0x10] sm:$0xf] %vm66_vm8, %v58_v30  ;;  %vm1474_vm7 = vcmask 900096   ;;  %vm1754_vm8 = vcmask 785408  }
  0x7c   :  { %65 = vst.msk [vmem:[#allocation2 + $0x8] sm:$0xff] %vm64_vm9, %v60_v31  ;;  %68 = vst.msk [vmem:[#allocation2 + $0x10] sm:$0xff] %vm64_vm9, %v6539_v10  ;;  %v615_v32 = vpop.permute.xlu1 %614  ;;  %v5638_v39 = vpop.permute.xlu0 %618  ;;  %vm2013_vm9 = vcmask 777216  }
  0x7d   :  { %v620_v43 = vrot.slane %v615_v32, 4  ;;  %v622_v1 = vrot.slane %v5638_v39, 4 }
  0x7f   :  { %v5620_v33 = vld [vmem:[#allocation2] sm:$0xff]  ;;  %v5662_v47 = vsel %vm623_vm10, %v620_v43, %v615_v32 }
  0x80   :  { %113 = vrot.lane.b32.xlu1 %v5620_v33, %s5507_s19  ;;  %v5624_v34 = vpop.permute.xlu1 %616  ;;  %v5646_v40 = vcombine.high %v5620_v33, %v5620_v33  ;;  %v897_v42 = vpop.permute.xlu0 %896  ;;  %v632_v52 = vmul.f32 %v5662_v47, %v5620_v33 }
  0x81   :  { %v621_v44 = vrot.slane %v5624_v34, 4  ;;  %v901_v50 = vrot.slane %v897_v42, 4 }
  0x83   :  { %v5626_v35 = vld [vmem:[#allocation2 + $0x8] sm:$0xff]  ;;  %v5628_v36 = vld [vmem:[#allocation2 + $0x10] sm:$0xff]  ;;  %v625_v51 = vsel %vm135_vm11, %v620_v43, %v621_v44  ;;  %v627_v18 = vsel %vm135_vm11, %v621_v44, %v622_v1 }
  0x84   :  { %117 = vrot.lane.b32.xlu0 %v5626_v35, %s5507_s19  ;;  %v5634_v37 = vcombine.high %v5628_v36, %v5628_v36  ;;  %121 = vrot.lane.b32.xlu1 %v5628_v36, %s5507_s19  ;;  %v895_v38 = vpop.permute.xlu1 %894  ;;  %v5659_v45 = vcombine.high %v5626_v35, %v5626_v35  ;;  %v1434_v48 = vpop.permute.xlu0 %1433  ;;  %v5673_v53 = vsel %vm623_vm10, %v625_v51, %v5624_v34 }
  0x85   :  { %v900_v49 = vrot.slane %v895_v38, 4  ;;  %v1439_v54 = vrot.slane %v1434_v48, 4  ;;  %v633_v60 = vmul.f32 %v5673_v53, %v5626_v35  ;;  %v5719_v23 = vsel %vm623_vm10, %v627_v18, %v5638_v39 }
  0x86   :  { %6554 = vst [vmem:[#allocation10_spill] sm:$0xff] %v5719_v23  ;;  %v634_v29 = vmul.f32 %v5719_v23, %v5628_v36  ;;  %vm6550_vm10 = vcmask 769024  }
  0x87   :  { %v5676_v55 = vsel %vm903_vm12, %v900_v49, %v895_v38  ;;  %v905_v58 = vsel %vm135_vm11, %v900_v49, %v901_v50  ;;  %v5687_v62 = vsel %vm1442_vm13, %v1439_v54, %v1434_v48  ;;  %v640_v38 = vcombine.high %v632_v52, %v632_v52 }
  0x88   :  { %123 = vrot.lane.b32.xlu0 %v5634_v37, %s5507_s19  ;;  %1182 = vrot.lane.b32.xlu1 %v5620_v33, %s5508_s20  ;;  %v899_v41 = vpop.permute.xlu1 %898  ;;  %v1438_v59 = vpop.permute.xlu0 %1437  ;;  %v912_v61 = vmul.f32 %v5676_v55, %v5620_v33  ;;  %v5690_v0 = vsel %vm903_vm12, %v905_v58, %v897_v42  ;;  %v1451_v5 = vmul.f32 %v5687_v62, %v5620_v33 }
  0x89   :  { %v902_v56 = vrot.slane %v899_v41, 4  ;;  %v913_v4 = vmul.f32 %v5690_v0, %v5626_v35  ;;  %v1441_v15 = vrot.slane %v1438_v59, 4  ;;  %v641_v42 = vcombine.high %v633_v60, %v633_v60 }
  0x8a   :  { %v642_v48 = vcombine.high %v634_v29, %v634_v29 }
  0x8b   :  { %v907_v2 = vsel %vm135_vm11, %v901_v50, %v902_v56  ;;  %v921_v50 = vcombine.high %v913_v4, %v913_v4 }
  0x8c   :  { %1184 = vrot.lane.b32.xlu0 %v5646_v40, %s5508_s20  ;;  %1190 = vrot.lane.b32.xlu1 %v5628_v36, %s5508_s20  ;;  %v1436_v46 = vpop.permute.xlu1 %1435  ;;  %v5701_v12 = vsel %vm903_vm12, %v907_v2, %v899_v41  ;;  %v1716_v13 = vpop.permute.xlu0 %1715  ;;  %v920_v41 = vcombine.high %v912_v61, %v912_v61  ;;  %vm2628_vm12 = vcmask 134144  }
  0x8d   :  { %v1440_v3 = vrot.slane %v1436_v46, 4  ;;  %v1720_v16 = vrot.slane %v1716_v13, 4  ;;  %v914_v19 = vmul.f32 %v5701_v12, %v5628_v36 }
  0x8f   :  { %v1444_v17 = vsel %vm135_vm11, %v1439_v54, %v1440_v3  ;;  %v1446_v26 = vsel %vm135_vm11, %v1440_v3, %v1441_v15 }
  0x90   :  { %1192 = vrot.lane.b32.xlu0 %v5634_v37, %s5508_s20  ;;  %1186 = vrot.lane.b32.xlu1 %v5626_v35, %s5508_s20  ;;  %v1714_v57 = vpop.permute.xlu1 %1713  ;;  %v5715_v22 = vsel %vm1442_vm13, %v1444_v17, %v1436_v46  ;;  %v5730_v30 = vsel %vm1442_vm13, %v1446_v26, %v1438_v59  ;;  %v1459_v46 = vcombine.high %v1451_v5, %v1451_v5  ;;  %v2253_v56 = vpop.permute.xlu0 %2252  ;;  %vm2655_vm13 = vcmask 1043592  }
  0x91   :  { %v1719_v63 = vrot.slane %v1714_v57, 4  ;;  %v1452_v28 = vmul.f32 %v5715_v22, %v5626_v35  ;;  %6555 = vst [vmem:[#allocation11_spill] sm:$0xff] %v5730_v30  ;;  %v1453_v32 = vmul.f32 %v5730_v30, %v5628_v36 }
  0x93   :  { %v5704_v14 = vsel %vm1722_vm14, %v1719_v63, %v1714_v57  ;;  %v1724_v27 = vsel %vm135_vm11, %v1719_v63, %v1720_v16  ;;  %v1461_v58 = vcombine.high %v1453_v32, %v1453_v32  ;;  %v1460_v59 = vcombine.high %v1452_v28, %v1452_v28 }
  0x94   :  { %119 = vrot.lane.b32.xlu0 %v5659_v45, %s5507_s19  ;;  %115 = vrot.lane.b32.xlu1 %v5646_v40, %s5507_s19  ;;  %v1731_v21 = vmul.f32 %v5704_v14, %v5620_v33  ;;  %v5733_v31 = vsel %vm1722_vm14, %v1724_v27, %v1716_v13  ;;  %v1718_v43 = vpop.permute.xlu1 %1717 }
  0x95   :  { %v1732_v34 = vmul.f32 %v5733_v31, %v5626_v35  ;;  %v1721_v44 = vrot.slane %v1718_v43, 4 }
  0x96   :  { %v1739_v39 = vcombine.high %v1731_v21, %v1731_v21 }
  0x97   :  { %v1726_v49 = vsel %vm135_vm11, %v1720_v16, %v1721_v44  ;;  %v1740_v63 = vcombine.high %v1732_v34, %v1732_v34 }
  0x98   :  { %1188 = vrot.lane.b32.xlu0 %v5659_v45, %s5508_s20  ;;  %643 = vrot.lane.b32.xlu1 %v632_v52, %s5509_s21  ;;  %v5751_v51 = vsel %vm1722_vm14, %v1726_v49, %v1718_v43  ;;  %v922_v52 = vcombine.high %v914_v19, %v914_v19  ;;  %v2255_v57 = vpop.permute.xlu1 %2254  ;;  %v99_v43 = vmul.f32 %v5626_v35, %v5600_v20  ;;  %vm2646_vm14 = vcmask 138240  }
  0x99   :  { %6556 = vst [vmem:[#allocation12_spill] sm:$0xff] %v5751_v51  ;;  %v1733_v54 = vmul.f32 %v5751_v51, %v5628_v36 }
  0x9c   :  { %647 = vrot.lane.b32.xlu0 %v633_v60, %s5509_s21  ;;  %923 = vrot.lane.b32.xlu1 %v912_v61, %s5510_s22  ;;  %v2258_v60 = vrot.slane %v2253_v56, 4  ;;  %v2259_v61 = vrot.slane %v2255_v57, 4 }
  0x9e   :  { %v5767_v1 = vsel %vm2261_vm15, %v2258_v60, %v2253_v56  ;;  %v2263_v2 = vsel %vm135_vm11, %v2258_v60, %v2259_v61 }
  0x9f   :  { %6557 = vst [vmem:[#allocation13_spill] sm:$0xff] %v5767_v1  ;;  %v2270_v3 = vmul.f32 %v5767_v1, %v5620_v33 }
  0xa0   :  { %927 = vrot.lane.b32.xlu0 %v913_v4, %s5510_s22  ;;  %1462 = vrot.lane.b32.xlu1 %v1451_v5, %s5511_s23  ;;  %v1741_v4 = vcombine.high %v1733_v54, %v1733_v54  ;;  %v5776_v5 = vsel %vm2261_vm15, %v2263_v2, %v2255_v57  ;;  %v362_v57 = vcombine.high %v99_v43, %v99_v43 }
  0xa1   :  { %6558 = vst [vmem:[#allocation14_spill] sm:$0xff] %v5776_v5  ;;  %v2278_v15 = vcombine.high %v2270_v3, %v2270_v3  ;;  %v2271_v16 = vmul.f32 %v5776_v5, %v5626_v35 }
  0xa4   :  { %931 = vrot.lane.b32.xlu0 %v914_v19, %s5510_s22  ;;  %1742 = vrot.lane.b32.xlu1 %v1731_v21, %s5512_s24  ;;  %v2279_v19 = vcombine.high %v2271_v16, %v2271_v16 }
  0xa8   :  { %1466 = vrot.lane.b32.xlu0 %v1452_v28, %s5511_s23  ;;  %651 = vrot.lane.b32.xlu1 %v634_v29, %s5509_s21 }
  0xac   :  { %1470 = vrot.lane.b32.xlu0 %v1453_v32, %s5511_s23  ;;  %1746 = vrot.lane.b32.xlu1 %v1732_v34, %s5512_s24 }
  0xb0   :  { %645 = vrot.lane.b32.xlu1 %v640_v38, %s5509_s21  ;;  %1744 = vrot.lane.b32.xlu0 %v1739_v39, %s5512_s24  ;;  %v98_v39 = vmul.f32 %v5620_v33, %v5605_v24 }
  0xb4   :  { %925 = vrot.lane.b32.xlu1 %v920_v41, %s5510_s22  ;;  %649 = vrot.lane.b32.xlu0 %v641_v42, %s5509_s21 }
  0xb8   :  { %1464 = vrot.lane.b32.xlu1 %v1459_v46, %s5511_s23  ;;  %653 = vrot.lane.b32.xlu0 %v642_v48, %s5509_s21 }
  0xbc   :  { %929 = vrot.lane.b32.xlu1 %v921_v50, %s5510_s22  ;;  %2005 = vrot.lane.b32.xlu0 %v5626_v35, %s5513_s25  ;;  %v5154_v50 = vld [vmem:[%s6531_s1 + $0x4] sm:$0xf] }
  0xc0   :  { %933 = vrot.lane.b32.xlu0 %v922_v52, %s5510_s22  ;;  %1750 = vrot.lane.b32.xlu1 %v1733_v54, %s5512_s24  ;;  %v71_v54 = vld [vmem:[#allocation2 + $0x10] sm:$0xf] }
  0xc4   :  { %2009 = vrot.lane.b32.xlu0 %v5628_v36, %s5513_s25  ;;  %2003 = vrot.lane.b32.xlu1 %v5646_v40, %s5513_s25  ;;  %v2257_v40 = vpop.permute.xlu0 %2256 }
  0xc5   :  { %v2260_v13 = vrot.slane %v2257_v40, 4 }
  0xc8   :  { %1472 = vrot.lane.b32.xlu0 %v1461_v58, %s5511_s23  ;;  %1468 = vrot.lane.b32.xlu1 %v1460_v59, %s5511_s23  ;;  %v101_v58 = vld [vmem:[%s6531_s1] sm:$0xf]  ;;  %v100_v59 = vmul.f32 %v5609_v25, %v71_v54 }
  0xcc   :  { %1748 = vrot.lane.b32.xlu0 %v1740_v63, %s5512_s24  ;;  %2007 = vrot.lane.b32.xlu1 %v5659_v45, %s5513_s25  ;;  %v2265_v45 = vsel %vm135_vm11, %v2259_v61, %v2260_v13 }
  0xcd   :  { %v5787_v17 = vsel %vm2261_vm15, %v2265_v45, %v2257_v40  ;;  %vm6098_vm15 = vmor %vm47_vm2, %vm2655_vm13  ;;  %vm6574_vm2 = vcmask 769024  }
  0xce   :  { %6559 = vst [vmem:[#allocation15_spill] sm:$0xff] %v5787_v17  ;;  %v2272_v18 = vmul.f32 %v5787_v17, %v5628_v36 }
  0xd0   :  { %2001 = vrot.lane.b32.xlu1 %v5620_v33, %s5513_s25  ;;  %1752 = vrot.lane.b32.xlu0 %v1741_v4, %s5512_s24  ;;  %v2280_v21 = vcombine.high %v2272_v18, %v2272_v18  ;;  %v361_v33 = vcombine.high %v98_v39, %v98_v39 }
  0xd4   :  { %2283 = vrot.lane.b32.xlu0 %v2278_v15, %s5514_s26  ;;  %2285 = vrot.lane.b32.xlu1 %v2271_v16, %s5514_s26 }
  0xd8   :  { %2011 = vrot.lane.b32.xlu0 %v5634_v37, %s5513_s25  ;;  %2281 = vrot.lane.b32.xlu1 %v2270_v3, %s5514_s26 }
  0xdc   :  { %2289 = vrot.lane.b32.xlu1 %v2272_v18, %s5514_s26  ;;  %2287 = vrot.lane.b32.xlu0 %v2279_v19, %s5514_s26 }
  0xe0   :  { %2291 = vrot.lane.b32.xlu0 %v2280_v21, %s5514_s26 }
  0xf2   :  { %v114_v26 = vpop.permute.xlu1 %113 }
  0xf6   :  { %v118_v27 = vpop.permute.xlu0 %117  ;;  %v122_v28 = vpop.permute.xlu1 %121 }
  0xfa   :  { %v124_v29 = vpop.permute.xlu0 %123  ;;  %v5797_v32 = vpop.permute.xlu1 %1182 }
  0xfb   :  { %v130_v56 = vsel %vm125_vm0, %v122_v28, %v124_v29 }
  0xfe   :  { %v5799_v37 = vpop.permute.xlu0 %1184  ;;  %v5801_v34 = vpop.permute.xlu1 %1190 }
 0x102   :  { %v5803_v38 = vpop.permute.xlu0 %1192  ;;  %v5805_v36 = vpop.permute.xlu1 %1186 }
 0x103   :  { %v1196_v54 = vsel %vm1194_vm6, %v5799_v37, %v5805_v36 }
 0x106   :  { %v120_v41 = vpop.permute.xlu0 %119  ;;  %v116_v42 = vpop.permute.xlu1 %115 }
 0x107   :  { %v127_v44 = vsel %vm125_vm0, %v116_v42, %v118_v27  ;;  %v129_v46 = vsel %vm125_vm0, %v120_v41, %v122_v28  ;;  %v126_v48 = vsel %vm125_vm0, %v114_v26, %v116_v42  ;;  %v128_v49 = vsel %vm125_vm0, %v118_v27, %v120_v41  ;;  %v5171_v26 = vld [vmem:[%s6531_s1 + $0x8] sm:$0xf] }
 0x108   :  { %5155 = vmatprep.subr.msk.mxu0 %vm135_vm11, %v127_v44  ;;  %5158 = vmatprep.subr.msk.mxu1 %vm135_vm11, %v129_v46 }
 0x109   :  { %5156 = vmatpush1.msk.msra.mxu0 %vm135_vm11, %v126_v48  ;;  %5159 = vmatpush1.msk.msra.mxu1 %vm135_vm11, %v128_v49  ;;  %v5180_v48 = vld [vmem:[%s6531_s1 + $0xc] sm:$0xf] }
 0x10a   :  { %v5822_v35 = vpop.permute.xlu0 %1188  ;;  %5157 = vmatmul.mubr.msk.f32.vlgmr.msra.gmra.mxu0 %vm131_vm1, %v5154_v50  ;;  %5350 = vmatprep.subr.mxu0 %v6539_v10  ;;  %v644_v52 = vpop.permute.xlu1 %643 }
 0x10b   :  { %5163 = vmatprep.subr.msk.mxu1 %vm135_vm11, %v361_v33  ;;  %5160 = vmatmul.mubr.msk.f32.vlgmr.msra.gmra.mxu1 %vm131_vm1, %v5154_v50 }
 0x10c   :  { %5351 = vmatpush3.msk.msra.mxu0 %vm135_vm11, %v130_v56  ;;  %5164 = vmatpush1.msk.msra.mxu1 %vm135_vm11, %v98_v39  ;;  %v1195_v56 = vsel %vm1194_vm6, %v5797_v32, %v5799_v37  ;;  %v1198_v32 = vsel %vm1194_vm6, %v5822_v35, %v5801_v34  ;;  %v1197_v37 = vsel %vm1194_vm6, %v5805_v36, %v5822_v35  ;;  %v5198_v35 = vld [vmem:[%s6531_s1 + $0x14] sm:$0xf] }
 0x10d   :  { %5166 = vmatprep.subr.msk.mxu0 %vm135_vm11, %v362_v57  ;;  %5352 = vmatprep.mubr.msk.f32.mxu0 %vm5515_vm3, %v6539_v10 }
 0x10e   :  { %v648_v60 = vpop.permute.xlu0 %647  ;;  %5353 = vmatmul.mubr.msk.f32.vlgmr.msra.gmra.mxu0 %vm131_vm1, %v5154_v50  ;;  %v924_v61 = vpop.permute.xlu1 %923  ;;  %440 = vmatprep.mubr.f32.mxu1 %v6539_v10 }
 0x10f   :  { %5167 = vmatpush1.msk.msra.mxu0 %vm135_vm11, %v99_v43  ;;  %5165 = vmatmul.mubr.msk.f32.vlgmr.msra.gmra.mxu1 %vm131_vm1, %v101_v58 }
 0x110   :  { %511 = vmatprep.mubr.f32.mxu0 %v6539_v10  ;;  %5355 = vmatprep.subr.mxu1 %v6539_v10 }
 0x111   :  { %5356 = vmatpush3.msk.msra.mxu1 %vm135_vm11, %v100_v59  ;;  %5357 = vmatprep.mubr.msk.f32.mxu1 %vm5515_vm3, %v6539_v10 }
 0x112   :  { %v928_v63 = vpop.permute.xlu0 %927  ;;  %v5847_v2 = vpop.permute.xlu1 %1462  ;;  %5168 = vmatmul.mubr.msk.f32.vlgmr.msra.gmra.mxu0 %vm131_vm1, %v101_v58 }
 0x113   :  { %5358 = vmatmul.mubr.msk.f32.vlgmr.msra.gmra.mxu1 %vm131_vm1, %v101_v58  ;;  %738 = vmatprep.mubr.f32.mxu0 %v6539_v10 }
 0x114   :  { %809 = vmatprep.mubr.f32.mxu1 %v6539_v10 }
 0x116   :  { %v932_v40 = vpop.permute.xlu0 %931  ;;  %v5853_v3 = vpop.permute.xlu1 %1742 }
 0x11a   :  { %v5855_v4 = vpop.permute.xlu0 %1466  ;;  %v652_v13 = vpop.permute.xlu1 %651 }
 0x11e   :  { %v5857_v15 = vpop.permute.xlu0 %1470  ;;  %v5859_v16 = vpop.permute.xlu1 %1746 }
 0x122   :  { %v5861_v45 = vpop.permute.xlu0 %1744  ;;  %v646_v18 = vpop.permute.xlu1 %645 }
 0x123   :  { %v656_v19 = vsel %vm655_vm4, %v644_v52, %v646_v18  ;;  %v657_v21 = vsel %vm655_vm4, %v646_v18, %v648_v60 }
 0x124   :  { %5172 = vmatprep.subr.msk.mxu0 %vm135_vm11, %v657_v21  ;;  %v1756_v21 = vsel %vm1754_vm8, %v5861_v45, %v5859_v16 }
 0x125   :  { %5173 = vmatpush1.msk.msra.mxu0 %vm135_vm11, %v656_v19 }
 0x126   :  { %v650_v27 = vpop.permute.xlu0 %649  ;;  %5174 = vmatmul.mubr.msk.f32.vlgmr.msra.gmra.mxu0 %vm131_vm1, %v5171_v26  ;;  %v926_v28 = vpop.permute.xlu1 %925  ;;  %5360 = vmatprep.subr.mxu0 %v6539_v10 }
 0x127   :  { %v658_v29 = vsel %vm655_vm4, %v648_v60, %v650_v27  ;;  %v659_v39 = vsel %vm655_vm4, %v650_v27, %v652_v13  ;;  %5362 = vmatprep.mubr.msk.f32.mxu0 %vm5515_vm3, %v6539_v10  ;;  %v937_v41 = vsel %vm935_vm5, %v926_v28, %v928_v63  ;;  %v936_v42 = vsel %vm935_vm5, %v924_v61, %v926_v28  ;;  %v5189_v60 = vld [vmem:[%s6531_s1 + $0x10] sm:$0xf] }
 0x128   :  { %5175 = vmatprep.subr.msk.mxu1 %vm135_vm11, %v659_v39  ;;  %v1199_v61 = vsel %vm1194_vm6, %v5801_v34, %v5803_v38 }
 0x129   :  { %5176 = vmatpush1.msk.msra.mxu1 %vm135_vm11, %v658_v29  ;;  %v5207_v29 = vld [vmem:[%s6531_s1 + $0x18] sm:$0xf] }
 0x12a   :  { %v654_v43 = vpop.permute.xlu0 %653  ;;  %v1465_v44 = vpop.permute.xlu1 %1464  ;;  %5177 = vmatmul.mubr.msk.f32.vlgmr.msra.gmra.mxu1 %vm131_vm1, %v5171_v26  ;;  %5181 = vmatprep.subr.msk.mxu1 %vm135_vm11, %v937_v41 }
 0x12b   :  { %v660_v46 = vsel %vm655_vm4, %v652_v13, %v654_v43  ;;  %5182 = vmatpush1.msk.msra.mxu1 %vm135_vm11, %v936_v42  ;;  %1018 = vmatprep.mubr.f32.mxu1 %v6539_v10  ;;  %v1475_v34 = vsel %vm1474_vm7, %v5847_v2, %v1465_v44 }
 0x12c   :  { %5361 = vmatpush3.msk.msra.mxu0 %vm135_vm11, %v660_v46  ;;  %5365 = vmatprep.subr.mxu1 %v6539_v10  ;;  %v5216_v46 = vld [vmem:[%s6531_s1 + $0x1c] sm:$0xf] }
 0x12d   :  { %5363 = vmatmul.mubr.msk.f32.vlgmr.msra.gmra.mxu0 %vm131_vm1, %v5171_v26  ;;  %v1755_v26 = vsel %vm1754_vm8, %v5853_v3, %v5861_v45 }
 0x12e   :  { %v5891_v49 = vpop.permute.xlu0 %2005  ;;  %v930_v50 = vpop.permute.xlu1 %929  ;;  %5183 = vmatmul.mubr.msk.f32.vlgmr.msra.gmra.mxu1 %vm131_vm1, %v5180_v48  ;;  %1089 = vmatprep.mubr.f32.mxu0 %v6539_v10 }
 0x12f   :  { %v938_v33 = vsel %vm935_vm5, %v928_v63, %v930_v50  ;;  %v939_v52 = vsel %vm935_vm5, %v930_v50, %v932_v40  ;;  %5367 = vmatprep.mubr.msk.f32.mxu1 %vm5515_vm3, %v6539_v10  ;;  %v1476_v63 = vsel %vm1474_vm7, %v1465_v44, %v5855_v4 }
 0x130   :  { %5184 = vmatprep.subr.msk.mxu0 %vm135_vm11, %v939_v52 }
 0x131   :  { %5185 = vmatpush1.msk.msra.mxu0 %vm135_vm11, %v938_v33 }
 0x132   :  { %v934_v57 = vpop.permute.xlu0 %933  ;;  %5186 = vmatmul.mubr.msk.f32.vlgmr.msra.gmra.mxu0 %vm131_vm1, %v5180_v48  ;;  %5190 = vmatprep.subr.msk.mxu0 %vm135_vm11, %v1196_v54  ;;  %v1751_v58 = vpop.permute.xlu1 %1750 }
 0x133   :  { %v940_v59 = vsel %vm935_vm5, %v932_v40, %v934_v57  ;;  %5191 = vmatpush1.msk.msra.mxu0 %vm135_vm11, %v1195_v56  ;;  %1277 = vmatprep.mubr.f32.mxu0 %v6539_v10  ;;  %v5225_v56 = vld [vmem:[%s6531_s1 + $0x20] sm:$0xf] }
 0x134   :  { %5366 = vmatpush3.msk.msra.mxu1 %vm135_vm11, %v940_v59  ;;  %5370 = vmatprep.subr.mxu0 %v6539_v10 }
 0x135   :  { %5368 = vmatmul.mubr.msk.f32.vlgmr.msra.gmra.mxu1 %vm131_vm1, %v5180_v48  ;;  %5193 = vmatprep.subr.msk.mxu1 %vm135_vm11, %v1198_v32 }
 0x136   :  { %v5930_v40 = vpop.permute.xlu0 %2009  ;;  %5192 = vmatmul.mubr.msk.f32.vlgmr.msra.gmra.mxu0 %vm131_vm1, %v5189_v60  ;;  %v2004_v13 = vpop.permute.xlu1 %2003  ;;  %5194 = vmatpush1.msk.msra.mxu1 %vm135_vm11, %v1197_v37 }
 0x137   :  { %5371 = vmatpush3.msk.msra.mxu0 %vm135_vm11, %v1199_v61  ;;  %5199 = vmatprep.subr.msk.mxu1 %vm135_vm11, %v1476_v63  ;;  %v2015_v3 = vsel %vm2013_vm9, %v2004_v13, %v5891_v49 }
 0x138   :  { %1348 = vmatprep.mubr.f32.mxu1 %v6539_v10  ;;  %5372 = vmatprep.mubr.msk.f32.mxu0 %vm5515_vm3, %v6539_v10 }
 0x139   :  { %5195 = vmatmul.mubr.msk.f32.vlgmr.msra.gmra.mxu1 %vm131_vm1, %v5189_v60 }
 0x13a   :  { %5200 = vmatpush1.msk.msra.mxu1 %vm135_vm11, %v1475_v34  ;;  %v1473_v38 = vpop.permute.xlu0 %1472  ;;  %5373 = vmatmul.mubr.msk.f32.vlgmr.msra.gmra.mxu0 %vm131_vm1, %v5189_v60  ;;  %v1469_v36 = vpop.permute.xlu1 %1468 }
 0x13b   :  { %v1479_v18 = vsel %vm1474_vm7, %v5857_v15, %v1473_v38  ;;  %v1477_v19 = vsel %vm1474_vm7, %v5855_v4, %v1469_v36  ;;  %v1478_v2 = vsel %vm1474_vm7, %v1469_v36, %v5857_v15  ;;  %1557 = vmatprep.mubr.f32.mxu1 %v6539_v10  ;;  %5375 = vmatprep.subr.mxu1 %v6539_v10 }
 0x13c   :  { %5202 = vmatprep.subr.msk.mxu0 %vm135_vm11, %v1478_v2  ;;  %1628 = vmatprep.mubr.f32.mxu0 %v6539_v10 }
 0x13d   :  { %5201 = vmatmul.mubr.msk.f32.vlgmr.msra.gmra.mxu1 %vm131_vm1, %v5198_v35  ;;  %5203 = vmatpush1.msk.msra.mxu0 %vm135_vm11, %v1477_v19 }
 0x13e   :  { %5376 = vmatpush3.msk.msra.mxu1 %vm135_vm11, %v1479_v18  ;;  %v1749_v4 = vpop.permute.xlu0 %1748  ;;  %5204 = vmatmul.mubr.msk.f32.vlgmr.msra.gmra.mxu0 %vm131_vm1, %v5198_v35  ;;  %v2008_v15 = vpop.permute.xlu1 %2007 }
 0x13f   :  { %v1757_v27 = vsel %vm1754_vm8, %v5859_v16, %v1749_v4  ;;  %v1758_v28 = vsel %vm1754_vm8, %v1749_v4, %v1751_v58  ;;  %5208 = vmatprep.subr.msk.mxu0 %vm135_vm11, %v1756_v21  ;;  %5377 = vmatprep.mubr.msk.f32.mxu1 %vm5515_vm3, %v6539_v10  ;;  %v2017_v42 = vsel %vm2013_vm9, %v2008_v15, %v5930_v40 }
 0x140   :  { %5209 = vmatpush1.msk.msra.mxu0 %vm135_vm11, %v1755_v26  ;;  %5211 = vmatprep.subr.msk.mxu1 %vm135_vm11, %v1758_v28  ;;  %v2016_v48 = vsel %vm2013_vm9, %v5891_v49, %v2008_v15 }
 0x141   :  { %5378 = vmatmul.mubr.msk.f32.vlgmr.msra.gmra.mxu1 %vm131_vm1, %v5198_v35  ;;  %1837 = vmatprep.mubr.f32.mxu0 %v6539_v10 }
 0x142   :  { %5212 = vmatpush1.msk.msra.mxu1 %vm135_vm11, %v1757_v27  ;;  %v1753_v16 = vpop.permute.xlu0 %1752  ;;  %v2002_v45 = vpop.permute.xlu1 %2001  ;;  %5210 = vmatmul.mubr.msk.f32.vlgmr.msra.gmra.mxu0 %vm131_vm1, %v5207_v29 }
 0x143   :  { %v1759_v39 = vsel %vm1754_vm8, %v1751_v58, %v1753_v16  ;;  %v2014_v41 = vsel %vm2013_vm9, %v2002_v45, %v2004_v13  ;;  %5217 = vmatprep.subr.msk.mxu1 %vm135_vm11, %v2015_v3  ;;  %5380 = vmatprep.subr.mxu0 %v6539_v10 }
 0x144   :  { %1908 = vmatprep.mubr.f32.mxu1 %v6539_v10  ;;  %5381 = vmatpush3.msk.msra.mxu0 %vm135_vm11, %v1759_v39 }
 0x145   :  { %5213 = vmatmul.mubr.msk.f32.vlgmr.msra.gmra.mxu1 %vm131_vm1, %v5207_v29  ;;  %5382 = vmatprep.mubr.msk.f32.mxu0 %vm5515_vm3, %v6539_v10 }
 0x146   :  { %5218 = vmatpush1.msk.msra.mxu1 %vm135_vm11, %v2014_v41  ;;  %v2284_v43 = vpop.permute.xlu0 %2283  ;;  %v2286_v44 = vpop.permute.xlu1 %2285  ;;  %5220 = vmatprep.subr.msk.mxu0 %vm135_vm11, %v2017_v42 }
 0x147   :  { %5383 = vmatmul.mubr.msk.f32.vlgmr.msra.gmra.mxu0 %vm131_vm1, %v5207_v29  ;;  %v2295_v50 = vsel %vm6550_vm10, %v2284_v43, %v2286_v44  ;;  %2096 = vmatprep.mubr.f32.mxu1 %v6539_v10 }
 0x148   :  { %5221 = vmatpush1.msk.msra.mxu0 %vm135_vm11, %v2016_v48  ;;  %2167 = vmatprep.mubr.f32.mxu0 %v6539_v10 }
 0x149   :  { %5226 = vmatprep.subr.msk.mxu0 %vm135_vm11, %v2295_v50  ;;  %5219 = vmatmul.mubr.msk.f32.vlgmr.msra.gmra.mxu1 %vm131_vm1, %v5216_v46 }
 0x14a   :  { %v2012_v33 = vpop.permute.xlu0 %2011  ;;  %v2282_v52 = vpop.permute.xlu1 %2281  ;;  %5385 = vmatprep.subr.mxu1 %v6539_v10  ;;  %5387 = vmatprep.mubr.msk.f32.mxu1 %vm5515_vm3, %v6539_v10 }
 0x14b   :  { %v2018_v49 = vsel %vm2013_vm9, %v5930_v40, %v2012_v33  ;;  %5222 = vmatmul.mubr.msk.f32.vlgmr.msra.gmra.mxu0 %vm131_vm1, %v5216_v46  ;;  %v2294_v54 = vsel %vm6550_vm10, %v2282_v52, %v2284_v43 }
 0x14c   :  { %5386 = vmatpush3.msk.msra.mxu1 %vm135_vm11, %v2018_v49  ;;  %5227 = vmatpush1.msk.msra.mxu0 %vm135_vm11, %v2294_v54 }
 0x14d   :  { %5388 = vmatmul.mubr.msk.f32.vlgmr.msra.gmra.mxu1 %vm131_vm1, %v5216_v46  ;;  %2376 = vmatprep.mubr.f32.mxu0 %v6539_v10 }
 0x14e   :  { %v2288_v57 = vpop.permute.xlu0 %2287  ;;  %v2290_v58 = vpop.permute.xlu1 %2289  ;;  %2447 = vmatprep.mubr.f32.mxu1 %v6539_v10  ;;  %5390 = vmatprep.subr.mxu0 %v6539_v10 }
 0x14f   :  { %v2296_v59 = vsel %vm6550_vm10, %v2286_v44, %v2288_v57  ;;  %5228 = vmatmul.mubr.msk.f32.vlgmr.msra.gmra.mxu0 %vm131_vm1, %v5225_v56  ;;  %v2297_v60 = vsel %vm6550_vm10, %v2288_v57, %v2290_v58 }
 0x150   :  { %5229 = vmatprep.subr.msk.mxu1 %vm135_vm11, %v2297_v60  ;;  %5392 = vmatprep.mubr.msk.f32.mxu0 %vm5515_vm3, %v6539_v10 }
 0x151   :  { %5230 = vmatpush1.msk.msra.mxu1 %vm135_vm11, %v2296_v59 }
 0x152   :  { %v2292_v32 = vpop.permute.xlu0 %2291  ;;  %5231 = vmatmul.mubr.msk.f32.vlgmr.msra.gmra.mxu1 %vm131_vm1, %v5225_v56 }
 0x153   :  { %v2298_v37 = vsel %vm6550_vm10, %v2290_v58, %v2292_v32  ;;  %2775 = vmatprep.mubr.f32.mxu1 %v6539_v10 }
 0x154   :  { %5391 = vmatpush3.msk.msra.mxu0 %vm135_vm11, %v2298_v37 }
 0x155   :  { %5393 = vmatmul.mubr.msk.f32.vlgmr.msra.gmra.mxu0 %vm131_vm1, %v5225_v56 }
 0x156   :  { %2846 = vmatprep.mubr.f32.mxu0 %v6539_v10 }
 0x1ca   :  { %v212_v61 = vpop.f32.mrf.mxu0 }
 0x1cb   :  { %v283_v63 = vpop.f32.mrf.mxu1 }
 0x1cc   :  { %v214_v40 = vpop.f32.mrf.mxu0 }
 0x1cd   :  { %v285_v13 = vpop.f32.mrf.mxu1 }
 0x1ce   :  { %v354_v34 = vpop.f32.mrf.mxu0 }
 0x1cf   :  { %v442_v38 = vpop.f32.mrf.mxu1 }
 0x1d0   :  { %v5354_v36 = vpop.f32.mrf.mxu0  ;;  %v443_v58 = vadd.f32 %v442_v38, %v212_v61 }
 0x1d1   :  { %v444_v35 = vpop.f32.mrf.mxu1 }
 0x1d2   :  { %v513_v2 = vpop.f32.mrf.mxu0  ;;  %v445_v32 = vadd.f32 %v444_v35, %v214_v40 }
 0x1d3   :  { %v584_v18 = vpop.f32.mrf.mxu1  ;;  %v514_v36 = vadd.f32 %v513_v2, %v283_v63 }
 0x1d4   :  { %v515_v21 = vpop.f32.mrf.mxu0 }
 0x1d5   :  { %v5359_v19 = vpop.f32.mrf.mxu1  ;;  %v516_v20 = vadd.f32 %v515_v21, %v285_v13  ;;  %v5151_v13 = vld [vmem:[%s6533_s3 + $0x3] ss:$4 sm:$0x1f] }
 0x1e6   :  { %v740_v4 = vpop.f32.mrf.mxu0 }
 0x1e7   :  { %v886_v37 = vadd.f32 %v740_v4, %v443_v58 }
 0x1e8   :  { %v742_v26 = vpop.f32.mrf.mxu0 }
 0x1e9   :  { %v887_v10 = vadd.f32 %v742_v26, %v445_v32 }
 0x1ea   :  { %v811_v15 = vpop.f32.mrf.mxu1 }
 0x1eb   :  { %v888_v25 = vadd.f32 %v811_v15, %v514_v36 }
 0x1ec   :  { %v813_v27 = vpop.f32.mrf.mxu1 }
 0x1ed   :  { %v882_v28 = vpop.f32.mrf.mxu0  ;;  %v889_v51 = vadd.f32 %v813_v27, %v516_v20 }
 0x1ee   :  { %v1020_v29 = vpop.f32.mrf.mxu1 }
 0x1ef   :  { %v5364_v3 = vpop.f32.mrf.mxu0 }
 0x1f0   :  { %v1022_v45 = vpop.f32.mrf.mxu1 }
 0x1f1   :  { %v1167_v1 = vadd.f32 %v1022_v45, %v887_v10 }
 0x1f2   :  { %v1091_v16 = vpop.f32.mrf.mxu0 }
 0x1f3   :  { %v1168_v30 = vadd.f32 %v1091_v16, %v888_v25 }
 0x1f4   :  { %v1093_v39 = vpop.f32.mrf.mxu0 }
 0x1f5   :  { %v1162_v41 = vpop.f32.mrf.mxu1  ;;  %v1169_v35 = vadd.f32 %v1093_v39, %v889_v51  ;;  %v6047_v39 = vrot.slane %v5151_v13, %v5583_v8 }
 0x1f6   :  { %v1279_v42 = vpop.f32.mrf.mxu0 }
 0x1f7   :  { %v5369_v43 = vpop.f32.mrf.mxu1 }
 0x1f8   :  { %v1281_v44 = vpop.f32.mrf.mxu0  ;;  %v1166_v43 = vadd.f32 %v1020_v29, %v886_v37 }
 0x1f9   :  { %v1350_v46 = vpop.f32.mrf.mxu1 }
 0x1fa   :  { %v1421_v48 = vpop.f32.mrf.mxu0  ;;  %v1425_v5 = vadd.f32 %v1279_v42, %v1166_v43  ;;  %v1427_v63 = vadd.f32 %v1350_v46, %v1168_v30  ;;  %v6050_v46 = vrot.slane %v5151_v13, %v5585_v9 }
 0x1fb   :  { %v1352_v50 = vpop.f32.mrf.mxu1 }
 0x1fc   :  { %v5374_v33 = vpop.f32.mrf.mxu0  ;;  %v1428_v10 = vadd.f32 %v1352_v50, %v1169_v35 }
 0x1fd   :  { %v1559_v52 = vpop.f32.mrf.mxu1  ;;  %v585_v33 = vadd.f32 %v584_v18, %v354_v34 }
 0x1fe   :  { %v1630_v49 = vpop.f32.mrf.mxu0  ;;  %v1705_v40 = vadd.f32 %v1559_v52, %v1425_v5 }
 0x1ff   :  { %v1561_v54 = vpop.f32.mrf.mxu1  ;;  %v890_v38 = vadd.f32 %v882_v28, %v585_v33  ;;  %v1707_v18 = vadd.f32 %v1630_v49, %v1427_v63 }
 0x200   :  { %v1632_v56 = vpop.f32.mrf.mxu0 }
 0x201   :  { %v1701_v57 = vpop.f32.mrf.mxu1  ;;  %v1170_v21 = vadd.f32 %v1162_v41, %v890_v38  ;;  %v1708_v30 = vadd.f32 %v1632_v56, %v1428_v10  ;;  %v6057_v56 = vrot.slane %v5151_v13, %v5591_v11 }
 0x202   :  { %v1839_v59 = vpop.f32.mrf.mxu0 }
 0x203   :  { %v5379_v60 = vpop.f32.mrf.mxu1  ;;  %v1985_v34 = vadd.f32 %v1839_v59, %v1705_v40 }
 0x204   :  { %v1841_v19 = vpop.f32.mrf.mxu0  ;;  %v1426_v60 = vadd.f32 %v1281_v44, %v1167_v1  ;;  %v6042_v1 = vrot.slane %v5151_v13, %v5581_v7 }
 0x205   :  { %v1910_v3 = vpop.f32.mrf.mxu1 }
 0x206   :  { %v1706_v15 = vadd.f32 %v1561_v54, %v1426_v60  ;;  %v1987_v51 = vadd.f32 %v1910_v3, %v1707_v18 }
 0x207   :  { %v1981_v24 = vpop.f32.mrf.mxu0  ;;  %v1912_v17 = vpop.f32.mrf.mxu1 }
 0x208   :  { %v1986_v26 = vadd.f32 %v1841_v19, %v1706_v15  ;;  %v1988_v41 = vadd.f32 %v1912_v17, %v1708_v30 }
 0x209   :  { %v5384_v23 = vpop.f32.mrf.mxu0  ;;  %v2098_v61 = vpop.f32.mrf.mxu1 }
 0x20a   :  { %v1429_v23 = vadd.f32 %v1421_v48, %v1170_v21  ;;  %v2244_v27 = vadd.f32 %v2098_v61, %v1985_v34 }
 0x20b   :  { %v2169_v2 = vpop.f32.mrf.mxu0  ;;  %v2100_v4 = vpop.f32.mrf.mxu1 }
 0x20c   :  { %v1709_v29 = vadd.f32 %v1701_v57, %v1429_v23  ;;  %v2245_v16 = vadd.f32 %v2100_v4, %v1986_v26  ;;  %v2246_v42 = vadd.f32 %v2169_v2, %v1987_v51 }
 0x20d   :  { %v2171_v20 = vpop.f32.mrf.mxu0  ;;  %v2240_v25 = vpop.f32.mrf.mxu1 }
 0x20e   :  { %v1989_v48 = vadd.f32 %v1981_v24, %v1709_v29  ;;  %v2247_v49 = vadd.f32 %v2171_v20, %v1988_v41  ;;  %v6063_v24 = vrot.slane %v5151_v13, %v5579_v6 }
 0x20f   :  { %v2378_v5 = vpop.f32.mrf.mxu0  ;;  %v5389_v28 = vpop.f32.mrf.mxu1 }
 0x210   :  { %v6044_v45 = vadd.f32 %v2378_v5, %v2244_v27  ;;  %v2248_v8 = vadd.f32 %v2240_v25, %v1989_v48  ;;  %v5516_v27 = vmov 0  }
 0x211   :  { %v2380_v44 = vpop.f32.mrf.mxu0  ;;  %5463 = vset.pattern.permute.xlu0 %v5516_v27  ;;  %5464 = vset.pattern.permute.xlu1 %v5516_v27 }
 0x212   :  { %v2555_v7 = vmul.f32 %v6042_v1, %v6044_v45  ;;  %v6054_v50 = vadd.f32 %v2380_v44, %v2245_v16  ;;  %v2449_v52 = vpop.f32.mrf.mxu1 }
 0x213   :  { %v2526_v54 = vadd.f32 %v2449_v52, %v2246_v42  ;;  %v2593_v42 = vld [vmem:[%s6534_s4] sm:$0xf]  ;;  %s5517_s4 = smov 17  }
 0x214   :  { %v2571_v17 = vmul.f32 %v2555_v7, %v6044_v45  ;;  %v2556_v57 = vmul.f32 %v6047_v39, %v6054_v50  ;;  %v2451_v9 = vpop.f32.mrf.mxu1  ;;  %v2560_v37 = vsel %vm135_vm11, %v2555_v7, 0.0  ;;  %v2595_v7 = vld [vmem:[%s6535_s5] sm:$0xf] }
 0x215   :  { %v2557_v58 = vmul.f32 %v6050_v46, %v2526_v54  ;;  %v2527_v59 = vadd.f32 %v2451_v9, %v2247_v49  ;;  %v2520_v32 = vpop.f32.mrf.mxu0 }
 0x216   :  { %v2561_v36 = vsel %vm135_vm11, %v2556_v57, 0.0  ;;  %v2572_v11 = vmul.f32 %v2556_v57, %v6054_v50  ;;  %v2528_v19 = vadd.f32 %v2520_v32, %v2248_v8  ;;  %v2576_v6 = vsel %vm135_vm11, %v2571_v17, 0.0 }
 0x217   :  { %v2573_v3 = vmul.f32 %v2557_v58, %v2526_v54  ;;  %v2558_v43 = vmul.f32 %v6057_v56, %v2527_v59  ;;  %v5394_v33 = vpop.f32.mrf.mxu0  ;;  %v2562_v61 = vadd.f32 %v2561_v36, %v2560_v37  ;;  %v2563_v38 = vsel %vm135_vm11, %v2557_v58, 0.0 }
 0x218   :  { %v2577_v60 = vsel %vm135_vm11, %v2572_v11, 0.0  ;;  %v2559_v40 = vmul.f32 %v6063_v24, %v2528_v19  ;;  %v6560_v8 = vmov 0.0  }
 0x219   :  { %v2574_v35 = vmul.f32 %v2558_v43, %v2527_v59  ;;  %v2564_v63 = vadd.f32 %v2563_v38, %v2562_v61  ;;  %v2565_v2 = vsel %vm135_vm11, %v2558_v43, 0.0  ;;  %v2578_v4 = vadd.f32 %v2577_v60, %v2576_v6  ;;  %2629 = vst.msk [vmem:[#allocation3] sm:$0xf] %vm2628_vm12, %v6560_v8 }
 0x21a   :  { %v2567_v13 = vsel %vm135_vm11, %v2559_v40, 0.0  ;;  %v2575_v21 = vmul.f32 %v2559_v40, %v2528_v19  ;;  %v2579_v15 = vsel %vm135_vm11, %v2573_v3, 0.0  ;;  %vm2659_vm12 = vcmask 138244  }
 0x21b   :  { %v2566_v34 = vadd.f32 %v2565_v2, %v2564_v63  ;;  %v2580_v10 = vadd.f32 %v2579_v15, %v2578_v4  ;;  %v2581_v18 = vsel %vm135_vm11, %v2574_v35, 0.0  ;;  %vm6106_vm10 = vmor %vm2659_vm12, %vm135_vm11 }
 0x21c   :  { %v2583_v20 = vsel %vm135_vm11, %v2575_v21, 0.0 }
 0x21d   :  { %v2568_v25 = vadd.f32 %v2567_v13, %v2566_v34  ;;  %v2582_v23 = vadd.f32 %v2581_v18, %v2580_v10 }
 0x21f   :  { %2569 = vadd.xlane.f32.xlu1 %v2568_v25  ;;  %v2584_v26 = vadd.f32 %v2583_v20, %v2582_v23 }
 0x221   :  { %2585 = vadd.xlane.f32.xlu0 %v2584_v26 }
 0x2a8   :  { %v2570_v30 = vpop.xlane.xlu1 %2569 }
 0x2a9   :  { %v2587_v51 = vmul.f32 0.001953125, %v2570_v30 }
 0x2aa   :  { %v2586_v5 = vpop.xlane.xlu0 %2585 }
 0x2ab   :  { %v2589_v28 = vmul.f32 %v2587_v51, %v2587_v51  ;;  %v2588_v29 = vmul.f32 0.001953125, %v2586_v5 }
 0x2ad   :  { %v2590_v16 = vsub.f32 %v2588_v29, %v2589_v28 }
 0x2af   :  { %v2591_v41 = vadd.f32 1e-05, %v2590_v16 }
 0x2b1   :  { %5473 = vrsqrt.f32 %v2591_v41 }
 0x2be   :  { %v5474_v44 = vpop.eup %5473 }
 0x2bf   :  { %v2594_v48 = vmul.f32 %v5474_v44, %v2593_v42 }
 0x2c1   :  { %2600 = vperm.xlu0 %5463, %v2594_v48   ;;  %v2596_v52 = vmul.f32 %v2594_v48, %v2587_v51 }
 0x2c3   :  { %v2597_v49 = vsub.f32 %v2595_v7, %v2596_v52  ;;  %v6566_v52 = vld [vmem:[#allocation11_spill] sm:$0xff] }
 0x2c5   :  { %2610 = vperm.xlu1 %5464, %v2597_v49  }
 0x33c   :  { %v2601_v17 = vpop.permute.xlu0 %2600 }
 0x33d   :  { %v2603_v57 = vmul.f32 %v2601_v17, %v6044_v45  ;;  %v2604_v9 = vmul.f32 %v2601_v17, %v6054_v50  ;;  %v2605_v58 = vmul.f32 %v2601_v17, %v2526_v54  ;;  %v2606_v32 = vmul.f32 %v2601_v17, %v2527_v59 }
 0x33e   :  { %v2607_v35 = vmul.f32 %v2601_v17, %v2528_v19 }
 0x340   :  { %v2611_v37 = vpop.permute.xlu1 %2610 }
 0x341   :  { %v2613_v36 = vadd.f32 %v2611_v37, %v2603_v57  ;;  %v2614_v11 = vadd.f32 %v2611_v37, %v2604_v9  ;;  %v2615_v3 = vadd.f32 %v2611_v37, %v2605_v58  ;;  %v2616_v43 = vadd.f32 %v2611_v37, %v2606_v32 }
 0x342   :  { %v2617_v54 = vadd.f32 %v2611_v37, %v2607_v35  ;;  %v6567_v37 = vld [vmem:[#allocation12_spill] sm:$0xff] }
 0x343   :  { %v2618_v33 = vmax.f32 %v2613_v36, 0.0  ;;  %v2619_v61 = vmax.f32 %v2614_v11, 0.0  ;;  %v2620_v38 = vmax.f32 %v2615_v3, 0.0  ;;  %v2621_v6 = vmax.f32 %v2616_v43, 0.0  ;;  %v6568_v43 = vld [vmem:[#allocation14_spill] sm:$0xff] }
 0x344   :  { %v2622_v2 = vmax.f32 %v2617_v54, 0.0 }
 0x345   :  { %v2623_v60 = vmul.f32 %v2618_v33, %v6042_v1  ;;  %v2624_v40 = vmul.f32 %v2619_v61, %v6047_v39  ;;  %v2625_v45 = vmul.f32 %v2620_v38, %v6050_v46  ;;  %v2626_v50 = vmul.f32 %v2621_v6, %v6057_v56  ;;  %v6569_v38 = vld [vmem:[#allocation13_spill] sm:$0xff] }
 0x346   :  { %v2627_v4 = vmul.f32 %v2622_v2, %v6063_v24 }
 0x347   :  { %v2635_v63 = vcombine.low %v2623_v60, %v2624_v40  ;;  %v2636_v59 = vcombine.low %v2625_v45, %v2626_v50  ;;  %v6570_v40 = vld [vmem:[#allocation15_spill] sm:$0xff] }
 0x349   :  { %2637 = vrot.lane.b32.xlu1 %v2635_v63, %s5517_s4 }
 0x34d   :  { %2639 = vrot.lane.b32.xlu1 %v2636_v59, %s5517_s4 }
 0x351   :  { %2641 = vrot.lane.b32.xlu1 %v2627_v4, %s5517_s4 }
 0x3bb   :  { %v2638_v19 = vpop.permute.xlu1 %2637 }
 0x3bc   :  { %v2643_v21 = vrot.slane %v2638_v19, 4 }
 0x3be   :  { %v2647_v15 = vsel %vm2646_vm14, %v2643_v21, %v2638_v19 }
 0x3bf   :  { %2657 = vst.msk [vmem:[#allocation3] sm:$0xff] %vm6098_vm15, %v2647_v15  ;;  %v2640_v34 = vpop.permute.xlu1 %2639 }
 0x3c0   :  { %v2644_v10 = vrot.slane %v2640_v34, 4 }
 0x3c2   :  { %v2648_v27 = vsel %vm135_vm11, %v2643_v21, %v2644_v10 }
 0x3c3   :  { %v2642_v18 = vpop.permute.xlu1 %2641  ;;  %v6124_v51 = vsel %vm2646_vm14, %v2648_v27, %v2640_v34 }
 0x3c4   :  { %v2645_v20 = vrot.slane %v2642_v18, 4  ;;  %v2679_v16 = vcombine.high %v6124_v51, %v6124_v51  ;;  %v3157_v42 = vmul.f32 %v6124_v51, %v5673_v53  ;;  %v4717_v33 = vmul.f32 %v6124_v51, %v6568_v43 }
 0x3c6   :  { %v2650_v23 = vsel %vm135_vm11, %v2644_v10, %v2645_v20  ;;  %v6111_v26 = vld [vmem:[#allocation3] sm:$0xff]  ;;  %v3165_v9 = vcombine.high %v3157_v42, %v3157_v42  ;;  %v4725_v45 = vcombine.high %v4717_v33, %v4717_v33  ;;  %v5234_v10 = vld [vmem:[%s6532_s2 + $0x4] sm:$0xf] }
 0x3c7   :  { %v2651_v30 = vsel %vm2646_vm14, %v2650_v23, %v2642_v18  ;;  %3686 = vrot.lane.b32.xlu0 %v6111_v26, %s5508_s20  ;;  %2681 = vrot.lane.b32.xlu1 %v6111_v26, %s5507_s19  ;;  %v2678_v5 = vcombine.high %v6111_v26, %v6111_v26  ;;  %v3156_v29 = vmul.f32 %v6111_v26, %v5662_v47  ;;  %v6571_v23 = vld [vmem:[#allocation8_spill] sm:$0xff] }
 0x3c8   :  { %2661 = vst.msk [vmem:[#allocation3 + $0x10] sm:$0xff] %vm6106_vm10, %v2651_v30  ;;  %v3417_v41 = vmul.f32 %v6111_v26, %v5676_v55  ;;  %v3418_v47 = vmul.f32 %v6124_v51, %v5690_v0  ;;  %v3936_v44 = vmul.f32 %v6111_v26, %v5687_v62  ;;  %v4197_v53 = vmul.f32 %v6111_v26, %v5704_v14 }
 0x3c9   :  { %2662 = vst.msk [vmem:[#allocation3 + $0x14] sm:$0xf] %vm2655_vm13, %v6560_v8  ;;  %v3937_v55 = vmul.f32 %v6124_v51, %v5715_v22  ;;  %v4198_v0 = vmul.f32 %v6124_v51, %v5733_v31  ;;  %v3164_v48 = vcombine.high %v3156_v29, %v3156_v29  ;;  %v6565_v22 = vld [vmem:[#allocation10_spill] sm:$0xff]  ;;  %v4716_v6 = vmul.f32 %v6111_v26, %v6569_v38 }
 0x3ca   :  { %v3425_v31 = vcombine.high %v3417_v41, %v3417_v41  ;;  %v3944_v17 = vcombine.high %v3936_v44, %v3936_v44  ;;  %v4205_v57 = vcombine.high %v4197_v53, %v4197_v53  ;;  %v2666_v27 = vmul.f32 %v6111_v26, %v6571_v23  ;;  %v5269_v23 = vld [vmem:[%s6532_s2 + $0x10] sm:$0xf] }
 0x3cb   :  { %3690 = vrot.lane.b32.xlu0 %v6124_v51, %s5508_s20  ;;  %2685 = vrot.lane.b32.xlu1 %v6124_v51, %s5507_s19  ;;  %v3945_v58 = vcombine.high %v3937_v55, %v3937_v55  ;;  %v4206_v11 = vcombine.high %v4198_v0, %v4198_v0  ;;  %v4724_v63 = vcombine.high %v4716_v6, %v4716_v6 }
 0x3cf   :  { %2683 = vrot.lane.b32.xlu1 %v2678_v5, %s5507_s19 }
 0x3d0   :  { %v6133_v28 = vld [vmem:[#allocation3 + $0x10] sm:$0xff] }
 0x3d1   :  { %2689 = vrot.lane.b32.xlu0 %v6133_v28, %s5507_s19  ;;  %v2680_v62 = vcombine.high %v6133_v28, %v6133_v28  ;;  %v3419_v14 = vmul.f32 %v6133_v28, %v5701_v12  ;;  %v3158_v7 = vmul.f32 %v6133_v28, %v6565_v22  ;;  %v3938_v49 = vmul.f32 %v6133_v28, %v6566_v52  ;;  %v6573_v22 = vld [vmem:[#allocation7_spill] sm:$0xff] }
 0x3d2   :  { %v3426_v12 = vcombine.high %v3418_v47, %v3418_v47  ;;  %v4199_v36 = vmul.f32 %v6133_v28, %v6567_v37  ;;  %v4718_v35 = vmul.f32 %v6133_v28, %v6570_v40  ;;  %v5251_v37 = vld [vmem:[%s6532_s2 + $0x8] sm:$0xf] }
 0x3d3   :  { %3688 = vrot.lane.b32.xlu1 %v2678_v5, %s5508_s20  ;;  %v3166_v32 = vcombine.high %v3158_v7, %v3158_v7  ;;  %v3427_v3 = vcombine.high %v3419_v14, %v3419_v14  ;;  %v3946_v61 = vcombine.high %v3938_v49, %v3938_v49 }
 0x3d4   :  { %v4207_v60 = vcombine.high %v4199_v36, %v4199_v36  ;;  %v4726_v50 = vcombine.high %v4718_v35, %v4718_v35 }
 0x3d5   :  { %3167 = vrot.lane.b32.xlu0 %v3156_v29, %s5509_s21 }
 0x3d7   :  { %2687 = vrot.lane.b32.xlu1 %v2679_v16, %s5507_s19 }
 0x3d9   :  { %3428 = vrot.lane.b32.xlu0 %v3417_v41, %s5510_s22 }
 0x3db   :  { %3171 = vrot.lane.b32.xlu1 %v3157_v42, %s5509_s21  ;;  %v2665_v42 = vld [vmem:[#allocation3 + $0x10] sm:$0xf] }
 0x3dd   :  { %3694 = vrot.lane.b32.xlu0 %v6133_v28, %s5508_s20 }
 0x3df   :  { %3432 = vrot.lane.b32.xlu1 %v3418_v47, %s5510_s22 }
 0x3e1   :  { %3947 = vrot.lane.b32.xlu0 %v3936_v44, %s5511_s23  ;;  %v6572_v44 = vld [vmem:[#allocation9_spill] sm:$0xff] }
 0x3e3   :  { %3692 = vrot.lane.b32.xlu1 %v2679_v16, %s5508_s20 }
 0x3e5   :  { %4208 = vrot.lane.b32.xlu0 %v4197_v53, %s5512_s24  ;;  %v2668_v53 = vmul.f32 %v2665_v42, %v6572_v44 }
 0x3e7   :  { %3951 = vrot.lane.b32.xlu1 %v3937_v55, %s5511_s23 }
 0x3e9   :  { %4212 = vrot.lane.b32.xlu0 %v4198_v0, %s5512_s24 }
 0x3eb   :  { %2691 = vrot.lane.b32.xlu1 %v2680_v62, %s5507_s19 }
 0x3ed   :  { %3169 = vrot.lane.b32.xlu0 %v3164_v48, %s5509_s21 }
 0x3ef   :  { %3436 = vrot.lane.b32.xlu1 %v3419_v14, %s5510_s22 }
 0x3f1   :  { %3175 = vrot.lane.b32.xlu0 %v3158_v7, %s5509_s21  ;;  %v2667_v7 = vmul.f32 %v6124_v51, %v6573_v22 }
 0x3f3   :  { %3696 = vrot.lane.b32.xlu1 %v2680_v62, %s5508_s20 }
 0x3f5   :  { %3430 = vrot.lane.b32.xlu0 %v3425_v31, %s5510_s22 }
 0x3f7   :  { %3955 = vrot.lane.b32.xlu1 %v3938_v49, %s5511_s23 }
 0x3f9   :  { %3949 = vrot.lane.b32.xlu0 %v3944_v17, %s5511_s23  ;;  %v2927_v17 = vcombine.high %v2667_v7, %v2667_v7 }
 0x3fb   :  { %4210 = vrot.lane.b32.xlu1 %v4205_v57, %s5512_s24 }
 0x3fd   :  { %3434 = vrot.lane.b32.xlu0 %v3426_v12, %s5510_s22 }
 0x3ff   :  { %3173 = vrot.lane.b32.xlu1 %v3165_v9, %s5509_s21 }
 0x401   :  { %3953 = vrot.lane.b32.xlu0 %v3945_v58, %s5511_s23 }
 0x403   :  { %3177 = vrot.lane.b32.xlu1 %v3166_v32, %s5509_s21 }
 0x405   :  { %4216 = vrot.lane.b32.xlu0 %v4199_v36, %s5512_s24 }
 0x407   :  { %4214 = vrot.lane.b32.xlu1 %v4206_v11, %s5512_s24 }
 0x409   :  { %4468 = vrot.lane.b32.xlu0 %v2678_v5, %s5513_s25 }
 0x40b   :  { %3438 = vrot.lane.b32.xlu1 %v3427_v3, %s5510_s22 }
 0x40d   :  { %4472 = vrot.lane.b32.xlu0 %v2679_v16, %s5513_s25  ;;  %v2926_v16 = vcombine.high %v2666_v27, %v2666_v27 }
 0x40f   :  { %4470 = vrot.lane.b32.xlu1 %v6124_v51, %s5513_s25 }
 0x411   :  { %4466 = vrot.lane.b32.xlu0 %v6111_v26, %s5513_s25  ;;  %v2669_v26 = vld [vmem:[%s6532_s2] sm:$0xf] }
 0x413   :  { %4474 = vrot.lane.b32.xlu1 %v6133_v28, %s5513_s25 }
 0x415   :  { %4731 = vrot.lane.b32.xlu0 %v4717_v33, %s5514_s26 }
 0x417   :  { %3957 = vrot.lane.b32.xlu1 %v3946_v61, %s5511_s23 }
 0x419   :  { %4727 = vrot.lane.b32.xlu0 %v4716_v6, %s5514_s26 }
 0x41b   :  { %4218 = vrot.lane.b32.xlu1 %v4207_v60, %s5512_s24 }
 0x41d   :  { %4735 = vrot.lane.b32.xlu0 %v4718_v35, %s5514_s26 }
 0x41f   :  { %4729 = vrot.lane.b32.xlu1 %v4724_v63, %s5514_s26 }
 0x423   :  { %4476 = vrot.lane.b32.xlu1 %v2680_v62, %s5513_s25 }
 0x427   :  { %4733 = vrot.lane.b32.xlu1 %v4725_v45, %s5514_s26 }
 0x42b   :  { %4737 = vrot.lane.b32.xlu1 %v4726_v50, %s5514_s26  ;;  %v5260_v50 = vld [vmem:[%s6532_s2 + $0xc] sm:$0xf] }
 0x439   :  { %v6217_v54 = vpop.permute.xlu0 %3686  ;;  %v2682_v59 = vpop.permute.xlu1 %2681 }
 0x43d   :  { %v2686_v2 = vpop.permute.xlu1 %2685  ;;  %v6219_v4 = vpop.permute.xlu0 %3690 }
 0x441   :  { %v2684_v19 = vpop.permute.xlu1 %2683 }
 0x442   :  { %v2693_v21 = vsel %vm125_vm0, %v2682_v59, %v2684_v19  ;;  %v2694_v15 = vsel %vm125_vm0, %v2684_v19, %v2686_v2 }
 0x443   :  { %v2690_v34 = vpop.permute.xlu0 %2689  ;;  %5235 = vmatprep.subr.msk.mxu1 %vm135_vm11, %v2694_v15 }
 0x444   :  { %5236 = vmatpush1.msk.msra.mxu1 %vm135_vm11, %v2693_v21 }
 0x445   :  { %v6228_v18 = vpop.permute.xlu1 %3688  ;;  %5237 = vmatmul.mubr.msk.f32.vlgmr.msra.gmra.mxu1 %vm131_vm1, %v5234_v10  ;;  %5395 = vmatprep.subr.mxu1 %v6560_v8 }
 0x446   :  { %5397 = vmatprep.mubr.msk.f32.mxu1 %vm5515_vm3, %v6560_v8  ;;  %v3699_v21 = vsel %vm1194_vm6, %v6228_v18, %v6219_v4 }
 0x447   :  { %v3168_v20 = vpop.permute.xlu0 %3167 }
 0x449   :  { %v2688_v30 = vpop.permute.xlu1 %2687 }
 0x44a   :  { %v2695_v5 = vsel %vm125_vm0, %v2686_v2, %v2688_v30  ;;  %v2696_v28 = vsel %vm125_vm0, %v2688_v30, %v2690_v34 }
 0x44b   :  { %v3429_v29 = vpop.permute.xlu0 %3428  ;;  %5238 = vmatprep.subr.msk.mxu0 %vm135_vm11, %v2696_v28 }
 0x44c   :  { %5239 = vmatpush1.msk.msra.mxu0 %vm135_vm11, %v2695_v5 }
 0x44d   :  { %5240 = vmatmul.mubr.msk.f32.vlgmr.msra.gmra.mxu0 %vm131_vm1, %v5234_v10  ;;  %5243 = vmatprep.subr.msk.mxu0 %vm135_vm11, %v2926_v16  ;;  %v3172_v41 = vpop.permute.xlu1 %3171 }
 0x44e   :  { %5244 = vmatpush1.msk.msra.mxu0 %vm135_vm11, %v2666_v27  ;;  %3005 = vmatprep.mubr.f32.mxu0 %v6560_v8 }
 0x44f   :  { %v6247_v47 = vpop.permute.xlu0 %3694  ;;  %5400 = vmatprep.subr.mxu0 %v6560_v8 }
 0x451   :  { %5245 = vmatmul.mubr.msk.f32.vlgmr.msra.gmra.mxu0 %vm131_vm1, %v2669_v26  ;;  %v3433_v55 = vpop.permute.xlu1 %3432 }
 0x452   :  { %5401 = vmatpush3.msk.msra.mxu0 %vm135_vm11, %v2668_v53  ;;  %5402 = vmatprep.mubr.msk.f32.mxu0 %vm5515_vm3, %v6560_v8 }
 0x453   :  { %v6255_v0 = vpop.permute.xlu0 %3947 }
 0x455   :  { %v6257_v62 = vpop.permute.xlu1 %3692  ;;  %5403 = vmatmul.mubr.msk.f32.vlgmr.msra.gmra.mxu0 %vm131_vm1, %v2669_v26 }
 0x456   :  { %3332 = vmatprep.mubr.f32.mxu0 %v6560_v8  ;;  %v3700_v5 = vsel %vm1194_vm6, %v6219_v4, %v6257_v62 }
 0x457   :  { %v6261_v48 = vpop.permute.xlu0 %4208 }
 0x459   :  { %v6263_v14 = vpop.permute.xlu1 %3951 }
 0x45b   :  { %v6267_v31 = vpop.permute.xlu0 %4212 }
 0x45d   :  { %v2692_v52 = vpop.permute.xlu1 %2691 }
 0x45e   :  { %v2697_v49 = vsel %vm125_vm0, %v2690_v34, %v2692_v52  ;;  %vm6575_vm0 = vmmov %vm6574_vm2 }
 0x45f   :  { %v3170_v57 = vpop.permute.xlu0 %3169  ;;  %5396 = vmatpush3.msk.msra.mxu1 %vm135_vm11, %v2697_v49 }
 0x460   :  { %v3180_v12 = vsel %vm655_vm4, %v3170_v57, %v3172_v41  ;;  %5398 = vmatmul.mubr.msk.f32.vlgmr.msra.gmra.mxu1 %vm131_vm1, %v5234_v10  ;;  %5246 = vmatprep.subr.msk.mxu1 %vm135_vm11, %v2927_v17  ;;  %v3179_v58 = vsel %vm655_vm4, %v3168_v20, %v3170_v57  ;;  %v3698_v10 = vsel %vm1194_vm6, %v6217_v54, %v6228_v18 }
 0x461   :  { %5247 = vmatpush1.msk.msra.mxu1 %vm135_vm11, %v2667_v7  ;;  %v3437_v9 = vpop.permute.xlu1 %3436  ;;  %3076 = vmatprep.mubr.f32.mxu1 %v6560_v8  ;;  %v3701_v54 = vsel %vm1194_vm6, %v6257_v62, %v6247_v47  ;;  %v5287_v62 = vld [vmem:[%s6532_s2 + $0x18] sm:$0xf] }
 0x462   :  { %5252 = vmatprep.subr.msk.mxu1 %vm135_vm11, %v3180_v12 }
 0x463   :  { %v3176_v51 = vpop.permute.xlu0 %3175 }
 0x464   :  { %5248 = vmatmul.mubr.msk.f32.vlgmr.msra.gmra.mxu1 %vm131_vm1, %v2669_v26  ;;  %v5278_v26 = vld [vmem:[%s6532_s2 + $0x14] sm:$0xf] }
 0x465   :  { %5253 = vmatpush1.msk.msra.mxu1 %vm135_vm11, %v3179_v58  ;;  %v3697_v32 = vpop.permute.xlu1 %3696  ;;  %3261 = vmatprep.mubr.f32.mxu1 %v6560_v8 }
 0x466   :  { %5405 = vmatprep.subr.mxu1 %v6560_v8  ;;  %v3702_v18 = vsel %vm1194_vm6, %v6247_v47, %v3697_v32 }
 0x467   :  { %v3431_v36 = vpop.permute.xlu0 %3430 }
 0x468   :  { %5254 = vmatmul.mubr.msk.f32.vlgmr.msra.gmra.mxu1 %vm131_vm1, %v5251_v37  ;;  %v3441_v40 = vsel %vm935_vm5, %v3431_v36, %v3433_v55  ;;  %v3440_v35 = vsel %vm935_vm5, %v3429_v29, %v3431_v36 }
 0x469   :  { %v6286_v11 = vpop.permute.xlu1 %3955  ;;  %5407 = vmatprep.mubr.msk.f32.mxu1 %vm5515_vm3, %v6560_v8 }
 0x46b   :  { %v3950_v3 = vpop.permute.xlu0 %3949 }
 0x46c   :  { %v3960_v16 = vsel %vm1474_vm7, %v3950_v3, %v6263_v14  ;;  %v3959_v4 = vsel %vm1474_vm7, %v6255_v0, %v3950_v3 }
 0x46d   :  { %v6290_v43 = vpop.permute.xlu1 %4210 }
 0x46e   :  { %v4221_v47 = vsel %vm1754_vm8, %v6290_v43, %v6267_v31  ;;  %v4220_v53 = vsel %vm1754_vm8, %v6261_v48, %v6290_v43 }
 0x46f   :  { %v3435_v33 = vpop.permute.xlu0 %3434 }
 0x470   :  { %v3443_v59 = vsel %vm935_vm5, %v3435_v33, %v3437_v9  ;;  %v3442_v19 = vsel %vm935_vm5, %v3433_v55, %v3435_v33 }
 0x471   :  { %v3174_v61 = vpop.permute.xlu1 %3173 }
 0x472   :  { %v3181_v38 = vsel %vm655_vm4, %v3172_v41, %v3174_v61  ;;  %v3182_v6 = vsel %vm655_vm4, %v3174_v61, %v3176_v51 }
 0x473   :  { %v3954_v60 = vpop.permute.xlu0 %3953  ;;  %5255 = vmatprep.subr.msk.mxu0 %vm135_vm11, %v3182_v6 }
 0x474   :  { %5256 = vmatpush1.msk.msra.mxu0 %vm135_vm11, %v3181_v38  ;;  %v3962_v28 = vsel %vm1474_vm7, %v3954_v60, %v6286_v11  ;;  %v3961_v41 = vsel %vm1474_vm7, %v6263_v14, %v3954_v60 }
 0x475   :  { %5257 = vmatmul.mubr.msk.f32.vlgmr.msra.gmra.mxu0 %vm131_vm1, %v5251_v37  ;;  %5261 = vmatprep.subr.msk.mxu0 %vm135_vm11, %v3441_v40  ;;  %v3178_v63 = vpop.permute.xlu1 %3177 }
 0x476   :  { %v3183_v45 = vsel %vm655_vm4, %v3176_v51, %v3178_v63  ;;  %5262 = vmatpush1.msk.msra.mxu0 %vm135_vm11, %v3440_v35  ;;  %3522 = vmatprep.mubr.f32.mxu0 %v6560_v8  ;;  %vm6576_vm4 = vmmov %vm6575_vm0 }
 0x477   :  { %v6307_v2 = vpop.permute.xlu0 %4216  ;;  %5406 = vmatpush3.msk.msra.mxu1 %vm135_vm11, %v3183_v45  ;;  %5410 = vmatprep.subr.mxu0 %v6560_v8 }
 0x478   :  { %5408 = vmatmul.mubr.msk.f32.vlgmr.msra.gmra.mxu1 %vm131_vm1, %v5251_v37  ;;  %5264 = vmatprep.subr.msk.mxu1 %vm135_vm11, %v3443_v59 }
 0x479   :  { %5263 = vmatmul.mubr.msk.f32.vlgmr.msra.gmra.mxu0 %vm131_vm1, %v5260_v50  ;;  %5265 = vmatpush1.msk.msra.mxu1 %vm135_vm11, %v3442_v19  ;;  %v4215_v15 = vpop.permute.xlu1 %4214 }
 0x47a   :  { %5270 = vmatprep.subr.msk.mxu1 %vm135_vm11, %v3699_v21  ;;  %3593 = vmatprep.mubr.f32.mxu1 %v6560_v8  ;;  %v4223_v48 = vsel %vm1754_vm8, %v4215_v15, %v6307_v2  ;;  %v4222_v14 = vsel %vm1754_vm8, %v6267_v31, %v4215_v15 }
 0x47b   :  { %v6321_v34 = vpop.permute.xlu0 %4468  ;;  %5412 = vmatprep.mubr.msk.f32.mxu0 %vm5515_vm3, %v6560_v8 }
 0x47c   :  { %5266 = vmatmul.mubr.msk.f32.vlgmr.msra.gmra.mxu1 %vm131_vm1, %v5260_v50 }
 0x47d   :  { %5271 = vmatpush1.msk.msra.mxu1 %vm135_vm11, %v3698_v10  ;;  %v3439_v20 = vpop.permute.xlu1 %3438  ;;  %3780 = vmatprep.mubr.f32.mxu1 %v6560_v8 }
 0x47e   :  { %v3444_v27 = vsel %vm935_vm5, %v3437_v9, %v3439_v20  ;;  %5415 = vmatprep.subr.mxu1 %v6560_v8  ;;  %v5296_v9 = vld [vmem:[%s6532_s2 + $0x1c] sm:$0xf]  ;;  %vm6577_vm5 = vmmov %vm6575_vm0 }
 0x47f   :  { %5411 = vmatpush3.msk.msra.mxu0 %vm135_vm11, %v3444_v27  ;;  %v4473_v30 = vpop.permute.xlu0 %4472 }
 0x480   :  { %5413 = vmatmul.mubr.msk.f32.vlgmr.msra.gmra.mxu0 %vm131_vm1, %v5260_v50  ;;  %5272 = vmatmul.mubr.msk.f32.vlgmr.msra.gmra.mxu1 %vm131_vm1, %v5269_v23 }
 0x481   :  { %5273 = vmatprep.subr.msk.mxu0 %vm135_vm11, %v3701_v54  ;;  %5416 = vmatpush3.msk.msra.mxu1 %vm135_vm11, %v3702_v18  ;;  %v4471_v29 = vpop.permute.xlu1 %4470 }
 0x482   :  { %5274 = vmatpush1.msk.msra.mxu0 %vm135_vm11, %v3700_v5  ;;  %5282 = vmatprep.subr.msk.mxu1 %vm135_vm11, %v3962_v28  ;;  %v4479_v7 = vsel %vm2013_vm9, %v6321_v34, %v4471_v29  ;;  %v4480_v57 = vsel %vm2013_vm9, %v4471_v29, %v4473_v30 }
 0x483   :  { %5279 = vmatprep.subr.msk.mxu0 %vm135_vm11, %v3960_v16  ;;  %3851 = vmatprep.mubr.f32.mxu0 %v6560_v8  ;;  %v4467_v44 = vpop.permute.xlu0 %4466 }
 0x484   :  { %5417 = vmatprep.mubr.msk.f32.mxu1 %vm5515_vm3, %v6560_v8  ;;  %5275 = vmatmul.mubr.msk.f32.vlgmr.msra.gmra.mxu0 %vm131_vm1, %v5269_v23  ;;  %v4478_v17 = vsel %vm2013_vm9, %v4467_v44, %v6321_v34 }
 0x485   :  { %5418 = vmatmul.mubr.msk.f32.vlgmr.msra.gmra.mxu1 %vm131_vm1, %v5269_v23  ;;  %5280 = vmatpush1.msk.msra.mxu0 %vm135_vm11, %v3959_v4  ;;  %v4475_v42 = vpop.permute.xlu1 %4474 }
 0x486   :  { %5283 = vmatpush1.msk.msra.mxu1 %vm135_vm11, %v3961_v41  ;;  %4041 = vmatprep.mubr.f32.mxu0 %v6560_v8  ;;  %v4481_v31 = vsel %vm2013_vm9, %v4473_v30, %v4475_v42 }
 0x487   :  { %5288 = vmatprep.subr.msk.mxu1 %vm135_vm11, %v4221_v47  ;;  %4112 = vmatprep.mubr.f32.mxu1 %v6560_v8  ;;  %v4732_v22 = vpop.permute.xlu0 %4731 }
 0x488   :  { %5281 = vmatmul.mubr.msk.f32.vlgmr.msra.gmra.mxu0 %vm131_vm1, %v5278_v26  ;;  %5420 = vmatprep.subr.mxu0 %v6560_v8 }
 0x489   :  { %5284 = vmatmul.mubr.msk.f32.vlgmr.msra.gmra.mxu1 %vm131_vm1, %v5278_v26  ;;  %v3958_v55 = vpop.permute.xlu1 %3957  ;;  %5422 = vmatprep.mubr.msk.f32.mxu0 %vm5515_vm3, %v6560_v8 }
 0x48a   :  { %5289 = vmatpush1.msk.msra.mxu1 %vm135_vm11, %v4220_v53  ;;  %v3963_v0 = vsel %vm1474_vm7, %v6286_v11, %v3958_v55  ;;  %4302 = vmatprep.mubr.f32.mxu1 %v6560_v8  ;;  %v5305_v11 = vld [vmem:[%s6532_s2 + $0x20] sm:$0xf]  ;;  %vm6578_vm7 = vmmov %vm6575_vm0 }
 0x48b   :  { %5421 = vmatpush3.msk.msra.mxu0 %vm135_vm11, %v3963_v0  ;;  %5425 = vmatprep.subr.mxu1 %v6560_v8  ;;  %v4728_v51 = vpop.permute.xlu0 %4727 }
 0x48c   :  { %5423 = vmatmul.mubr.msk.f32.vlgmr.msra.gmra.mxu0 %vm131_vm1, %v5278_v26  ;;  %5291 = vmatprep.subr.msk.mxu0 %vm135_vm11, %v4223_v48 }
 0x48d   :  { %5290 = vmatmul.mubr.msk.f32.vlgmr.msra.gmra.mxu1 %vm131_vm1, %v5287_v62  ;;  %5292 = vmatpush1.msk.msra.mxu0 %vm135_vm11, %v4222_v14  ;;  %v4219_v52 = vpop.permute.xlu1 %4218 }
 0x48e   :  { %v4224_v49 = vsel %vm1754_vm8, %v6307_v2, %v4219_v52  ;;  %5297 = vmatprep.subr.msk.mxu0 %vm135_vm11, %v4479_v7  ;;  %4373 = vmatprep.mubr.f32.mxu0 %v6560_v8 }
 0x48f   :  { %5426 = vmatpush3.msk.msra.mxu1 %vm135_vm11, %v4224_v49  ;;  %5427 = vmatprep.mubr.msk.f32.mxu1 %vm5515_vm3, %v6560_v8  ;;  %v4736_v3 = vpop.permute.xlu0 %4735 }
 0x490   :  { %5293 = vmatmul.mubr.msk.f32.vlgmr.msra.gmra.mxu0 %vm131_vm1, %v5287_v62  ;;  %5300 = vmatprep.subr.msk.mxu1 %vm135_vm11, %v4481_v31 }
 0x491   :  { %5428 = vmatmul.mubr.msk.f32.vlgmr.msra.gmra.mxu1 %vm131_vm1, %v5287_v62  ;;  %5298 = vmatpush1.msk.msra.mxu0 %vm135_vm11, %v4478_v17  ;;  %v4730_v12 = vpop.permute.xlu1 %4729 }
 0x492   :  { %5301 = vmatpush1.msk.msra.mxu1 %vm135_vm11, %v4480_v57  ;;  %v4740_v58 = vsel %vm6574_vm2, %v4730_v12, %v4732_v22  ;;  %4560 = vmatprep.mubr.f32.mxu0 %v6560_v8  ;;  %v4739_v32 = vsel %vm6575_vm0, %v4728_v51, %v4730_v12 }
 0x493   :  { %4631 = vmatprep.mubr.f32.mxu1 %v6560_v8  ;;  %5306 = vmatprep.subr.msk.mxu1 %vm135_vm11, %v4740_v58 }
 0x494   :  { %5299 = vmatmul.mubr.msk.f32.vlgmr.msra.gmra.mxu0 %vm131_vm1, %v5296_v9  ;;  %5430 = vmatprep.subr.mxu0 %v6560_v8 }
 0x495   :  { %5302 = vmatmul.mubr.msk.f32.vlgmr.msra.gmra.mxu1 %vm131_vm1, %v5296_v9  ;;  %v4477_v37 = vpop.permute.xlu1 %4476  ;;  %5432 = vmatprep.mubr.msk.f32.mxu0 %vm5515_vm3, %v6560_v8 }
 0x496   :  { %5307 = vmatpush1.msk.msra.mxu1 %vm135_vm11, %v4739_v32  ;;  %v4482_v36 = vsel %vm2013_vm9, %v4475_v42, %v4477_v37  ;;  %4821 = vmatprep.mubr.f32.mxu1 %v6560_v8 }
 0x497   :  { %5431 = vmatpush3.msk.msra.mxu0 %vm135_vm11, %v4482_v36  ;;  %5435 = vmatprep.subr.mxu1 %v6560_v8 }
 0x498   :  { %5433 = vmatmul.mubr.msk.f32.vlgmr.msra.gmra.mxu0 %vm131_vm1, %v5296_v9 }
 0x499   :  { %5308 = vmatmul.mubr.msk.f32.vlgmr.msra.gmra.mxu1 %vm131_vm1, %v5305_v11  ;;  %v4734_v43 = vpop.permute.xlu1 %4733  ;;  %4892 = vmatprep.mubr.f32.mxu0 %v6560_v8 }
 0x49a   :  { %v4741_v33 = vsel %vm6576_vm4, %v4732_v22, %v4734_v43  ;;  %v4742_v61 = vsel %vm6577_vm5, %v4734_v43, %v4736_v3  ;;  %5437 = vmatprep.mubr.msk.f32.mxu1 %vm5515_vm3, %v6560_v8 }
 0x49b   :  { %5309 = vmatprep.subr.msk.mxu0 %vm135_vm11, %v4742_v61 }
 0x49c   :  { %5310 = vmatpush1.msk.msra.mxu0 %vm135_vm11, %v4741_v33 }
 0x49d   :  { %5311 = vmatmul.mubr.msk.f32.vlgmr.msra.gmra.mxu0 %vm131_vm1, %v5305_v11  ;;  %v4738_v38 = vpop.permute.xlu1 %4737 }
 0x49e   :  { %v4743_v6 = vsel %vm6578_vm7, %v4736_v3, %v4738_v38 }
 0x49f   :  { %5436 = vmatpush3.msk.msra.mxu1 %vm135_vm11, %v4743_v6 }
 0x4a0   :  { %5438 = vmatmul.mubr.msk.f32.vlgmr.msra.gmra.mxu1 %vm131_vm1, %v5305_v11  ;;  %vm5130_vm1 = vcmask 515072  }
 0x505   :  { %v2777_v8 = vpop.f32.mrf.mxu1 }
 0x507   :  { %v2779_v59 = vpop.f32.mrf.mxu1 }
 0x50d   :  { %v2848_v60 = vpop.f32.mrf.mxu0 }
 0x50f   :  { %v2850_v40 = vpop.f32.mrf.mxu0 }
 0x511   :  { %v3007_v35 = vpop.f32.mrf.mxu0 }
 0x512   :  { %v3008_v0 = vadd.f32 %v3007_v35, %v2777_v8 }
 0x513   :  { %v3009_v63 = vpop.f32.mrf.mxu0 }
 0x514   :  { %v3010_v14 = vadd.f32 %v3009_v63, %v2779_v59 }
 0x515   :  { %v3149_v45 = vpop.f32.mrf.mxu0 }
 0x517   :  { %v5404_v50 = vpop.f32.mrf.mxu0 }
 0x520   :  { %v2919_v2 = vpop.f32.mrf.mxu1 }
 0x521   :  { %v3150_v3 = vadd.f32 %v3149_v45, %v2919_v2 }
 0x522   :  { %v5399_v19 = vpop.f32.mrf.mxu1 }
 0x524   :  { %v3078_v21 = vpop.f32.mrf.mxu1 }
 0x525   :  { %v3079_v17 = vadd.f32 %v3078_v21, %v2848_v60 }
 0x526   :  { %v3080_v15 = vpop.f32.mrf.mxu1 }
 0x527   :  { %v3081_v11 = vadd.f32 %v3080_v15, %v2850_v40 }
 0x528   :  { %v3263_v34 = vpop.f32.mrf.mxu1 }
 0x529   :  { %v3409_v52 = vadd.f32 %v3263_v34, %v3008_v0 }
 0x52a   :  { %v3265_v20 = vpop.f32.mrf.mxu1 }
 0x52b   :  { %v3410_v57 = vadd.f32 %v3265_v20, %v3010_v14 }
 0x535   :  { %v3334_v10 = vpop.f32.mrf.mxu0 }
 0x536   :  { %v3411_v58 = vadd.f32 %v3334_v10, %v3079_v17 }
 0x537   :  { %v3336_v23 = vpop.f32.mrf.mxu0 }
 0x538   :  { %v3405_v27 = vpop.f32.mrf.mxu1  ;;  %v3412_v35 = vadd.f32 %v3336_v23, %v3081_v11 }
 0x539   :  { %v3524_v54 = vpop.f32.mrf.mxu0  ;;  %v3413_v63 = vadd.f32 %v3405_v27, %v3150_v3 }
 0x53a   :  { %v5409_v18 = vpop.f32.mrf.mxu1  ;;  %v3670_v12 = vadd.f32 %v3524_v54, %v3409_v52 }
 0x53b   :  { %v3526_v5 = vpop.f32.mrf.mxu0 }
 0x53c   :  { %v3595_v30 = vpop.f32.mrf.mxu1  ;;  %v3671_v32 = vadd.f32 %v3526_v5, %v3410_v57 }
 0x53d   :  { %v3672_v33 = vadd.f32 %v3595_v30, %v3411_v58 }
 0x53e   :  { %v3597_v28 = vpop.f32.mrf.mxu1 }
 0x53f   :  { %v3673_v21 = vadd.f32 %v3597_v28, %v3412_v35 }
 0x540   :  { %v3666_v29 = vpop.f32.mrf.mxu0  ;;  %v3782_v16 = vpop.f32.mrf.mxu1 }
 0x541   :  { %v3928_v37 = vadd.f32 %v3782_v16, %v3670_v12  ;;  %v3674_v34 = vadd.f32 %v3666_v29, %v3413_v63 }
 0x542   :  { %v5414_v4 = vpop.f32.mrf.mxu0  ;;  %v3784_v41 = vpop.f32.mrf.mxu1 }
 0x543   :  { %v3929_v61 = vadd.f32 %v3784_v41, %v3671_v32 }
 0x544   :  { %v3853_v42 = vpop.f32.mrf.mxu0 }
 0x545   :  { %v3924_v26 = vpop.f32.mrf.mxu1  ;;  %v3930_v8 = vadd.f32 %v3853_v42, %v3672_v33 }
 0x546   :  { %v3855_v47 = vpop.f32.mrf.mxu0  ;;  %v3932_v45 = vadd.f32 %v3924_v26, %v3674_v34 }
 0x547   :  { %v5419_v44 = vpop.f32.mrf.mxu1  ;;  %v3931_v2 = vadd.f32 %v3855_v47, %v3673_v21 }
 0x548   :  { %v4043_v53 = vpop.f32.mrf.mxu0 }
 0x549   :  { %v4114_v55 = vpop.f32.mrf.mxu1  ;;  %v4189_v38 = vadd.f32 %v4043_v53, %v3928_v37 }
 0x54a   :  { %v4045_v62 = vpop.f32.mrf.mxu0  ;;  %v4191_v20 = vadd.f32 %v4114_v55, %v3930_v8  ;;  %v5037_v8 = vld [vmem:[#allocation2] sm:$0xff] }
 0x54b   :  { %v4116_v48 = vpop.f32.mrf.mxu1  ;;  %v4190_v60 = vadd.f32 %v4045_v62, %v3929_v61 }
 0x54c   :  { %v4185_v22 = vpop.f32.mrf.mxu0  ;;  %v4192_v27 = vadd.f32 %v4116_v48, %v3931_v2 }
 0x54d   :  { %v4304_v7 = vpop.f32.mrf.mxu1  ;;  %v4193_v4 = vadd.f32 %v4185_v22, %v3932_v45 }
 0x54e   :  { %v5424_v49 = vpop.f32.mrf.mxu0  ;;  %v4450_v59 = vadd.f32 %v4304_v7, %v4189_v38 }
 0x54f   :  { %v4306_v31 = vpop.f32.mrf.mxu1 }
 0x550   :  { %v4375_v9 = vpop.f32.mrf.mxu0  ;;  %v4451_v54 = vadd.f32 %v4306_v31, %v4190_v60  ;;  %v5043_v60 = vcombine.high %v5037_v8, %v5037_v8 }
 0x551   :  { %v4446_v51 = vpop.f32.mrf.mxu1  ;;  %v4452_v30 = vadd.f32 %v4375_v9, %v4191_v20 }
 0x552   :  { %v4377_v36 = vpop.f32.mrf.mxu0  ;;  %v4454_v44 = vadd.f32 %v4446_v51, %v4193_v4 }
 0x553   :  { %v5429_v43 = vpop.f32.mrf.mxu1  ;;  %v4453_v53 = vadd.f32 %v4377_v36, %v4192_v27 }
 0x554   :  { %v4562_v6 = vpop.f32.mrf.mxu0 }
 0x555   :  { %v4633_v50 = vpop.f32.mrf.mxu1  ;;  %v4708_v18 = vadd.f32 %v4562_v6, %v4450_v59  ;;  %v5038_v59 = vld [vmem:[#allocation2 + $0x8] sm:$0xff] }
 0x556   :  { %v4564_v19 = vpop.f32.mrf.mxu0  ;;  %v4710_v42 = vadd.f32 %v4633_v50, %v4452_v30  ;;  %v5044_v27 = vcombine.high %v5038_v59, %v5038_v59 }
 0x557   :  { %v4635_v10 = vpop.f32.mrf.mxu1  ;;  %v4709_v5 = vadd.f32 %v4564_v19, %v4451_v54 }
 0x558   :  { %v4704_v40 = vpop.f32.mrf.mxu0  ;;  %v4711_v62 = vadd.f32 %v4635_v10, %v4453_v53 }
 0x559   :  { %v4823_v15 = vpop.f32.mrf.mxu1  ;;  %v4712_v48 = vadd.f32 %v4704_v40, %v4454_v44  ;;  %v5012_v40 = vld [vmem:[%s6536_s6] sm:$0xf]  ;;  %s5518_s6 = smov 63  }
 0x55a   :  { %v6453_v16 = vadd.f32 %v4823_v15, %v4708_v18  ;;  %v5434_v23 = vpop.f32.mrf.mxu0  ;;  %v5014_v15 = vld [vmem:[%s6537_s7] sm:$0xf]  ;;  %s5519_s7 = smov [#allocation4]  }
 0x55b   :  { %v4825_v41 = vpop.f32.mrf.mxu1 }
 0x55c   :  { %v4974_v28 = vmul.f32 %v6453_v16, %v6042_v1  ;;  %v6457_v29 = vadd.f32 %v4825_v41, %v4709_v5  ;;  %v5039_v5 = vld [vmem:[#allocation2 + $0x10] sm:$0xff] }
 0x55d   :  { %v4894_v55 = vpop.f32.mrf.mxu0  ;;  %v5045_v4 = vcombine.high %v5039_v5, %v5039_v5 }
 0x55e   :  { %v4990_v26 = vmul.f32 %v4974_v28, %v6453_v16  ;;  %v4975_v47 = vmul.f32 %v6457_v29, %v6047_v39  ;;  %v6462_v0 = vadd.f32 %v4894_v55, %v4710_v42  ;;  %v4979_v22 = vsel %vm135_vm11, %v4974_v28, 0.0 }
 0x55f   :  { %v4896_v14 = vpop.f32.mrf.mxu0 }
 0x560   :  { %v4980_v7 = vsel %vm135_vm11, %v4975_v47, 0.0  ;;  %v4991_v1 = vmul.f32 %v4975_v47, %v6457_v29  ;;  %v4976_v52 = vmul.f32 %v6462_v0, %v6050_v46  ;;  %v4965_v49 = vpop.f32.mrf.mxu1  ;;  %v6469_v17 = vadd.f32 %v4896_v14, %v4711_v62 }
 0x561   :  { %v4981_v31 = vadd.f32 %v4980_v7, %v4979_v22  ;;  %v6471_v57 = vadd.f32 %v4965_v49, %v4712_v48  ;;  %v4995_v39 = vsel %vm135_vm11, %v4990_v26, 0.0 }
 0x562   :  { %v4996_v12 = vsel %vm135_vm11, %v4991_v1, 0.0  ;;  %v4982_v9 = vsel %vm135_vm11, %v4976_v52, 0.0  ;;  %v4992_v51 = vmul.f32 %v4976_v52, %v6462_v0  ;;  %v5439_v58 = vpop.f32.mrf.mxu1  ;;  %v4977_v37 = vmul.f32 %v6469_v17, %v6057_v56 }
 0x563   :  { %v4997_v32 = vadd.f32 %v4996_v12, %v4995_v39  ;;  %v4978_v46 = vmul.f32 %v6471_v57, %v6063_v24  ;;  %v4983_v36 = vadd.f32 %v4982_v9, %v4981_v31 }
 0x564   :  { %v4998_v11 = vsel %vm135_vm11, %v4992_v51, 0.0  ;;  %v4993_v3 = vmul.f32 %v4977_v37, %v6469_v17  ;;  %v4984_v33 = vsel %vm135_vm11, %v4977_v37, 0.0 }
 0x565   :  { %v4994_v43 = vmul.f32 %v4978_v46, %v6471_v57  ;;  %v4986_v61 = vsel %vm135_vm11, %v4978_v46, 0.0  ;;  %v4985_v38 = vadd.f32 %v4984_v33, %v4983_v36  ;;  %v4999_v6 = vadd.f32 %v4998_v11, %v4997_v32 }
 0x566   :  { %v5000_v35 = vsel %vm135_vm11, %v4993_v3, 0.0 }
 0x567   :  { %v5002_v56 = vsel %vm135_vm11, %v4994_v43, 0.0  ;;  %v4987_v63 = vadd.f32 %v4986_v61, %v4985_v38  ;;  %v5001_v50 = vadd.f32 %v5000_v35, %v4999_v6 }
 0x569   :  { %4988 = vadd.xlane.f32.xlu0 %v4987_v63  ;;  %v5003_v24 = vadd.f32 %v5002_v56, %v5001_v50 }
 0x56b   :  { %5004 = vadd.xlane.f32.xlu1 %v5003_v24 }
 0x57c   :  { %5048 = vrot.lane.b32.xlu1 %v5043_v60, %s5508_s20 }
 0x57f   :  { %5046 = vrot.lane.b32.xlu0 %v5037_v8, %s5508_s20 }
 0x583   :  { %5050 = vrot.lane.b32.xlu0 %v5038_v59, %s5508_s20 }
 0x5f2   :  { %v4989_v19 = vpop.xlane.xlu0 %4988 }
 0x5f3   :  { %v5006_v21 = vmul.f32 0.001953125, %v4989_v19 }
 0x5f4   :  { %v5005_v34 = vpop.xlane.xlu1 %5004 }
 0x5f5   :  { %v5008_v10 = vmul.f32 %v5006_v21, %v5006_v21  ;;  %v5007_v20 = vmul.f32 0.001953125, %v5005_v34 }
 0x5f6   :  { %v5047_v41 = vpop.permute.xlu0 %5046 }
 0x5f7   :  { %v5009_v54 = vsub.f32 %v5007_v20, %v5008_v10 }
 0x5f8   :  { %v5049_v28 = vpop.permute.xlu1 %5048 }
 0x5f9   :  { %v5010_v18 = vadd.f32 1e-05, %v5009_v54  ;;  %v5058_v48 = vsel %vm1194_vm6, %v5047_v41, %v5049_v28 }
 0x5fa   :  { %v5051_v42 = vpop.permute.xlu0 %5050 }
 0x5fb   :  { %5475 = vrsqrt.f32 %v5010_v18  ;;  %v5059_v14 = vsel %vm1194_vm6, %v5049_v28, %v5051_v42 }
 0x608   :  { %v5476_v45 = vpop.eup %5475 }
 0x609   :  { %v5013_v2 = vmul.f32 %v5476_v45, %v5012_v40 }
 0x60b   :  { %5019 = vperm.xlu0 %5463, %v5013_v2   ;;  %v5015_v30 = vmul.f32 %v5013_v2, %v5006_v21 }
 0x60d   :  { %v5016_v23 = vsub.f32 %v5014_v15, %v5015_v30 }
 0x60f   :  { %5029 = vperm.xlu1 %5464, %v5016_v23   ;;  %5054 = vrot.lane.b32.xlu0 %v5039_v5, %s5508_s20 }
 0x613   :  { %5052 = vrot.lane.b32.xlu1 %v5044_v27, %s5508_s20 }
 0x617   :  { %5056 = vrot.lane.b32.xlu1 %v5045_v4, %s5508_s20  ;;  %s5140_s20 = sshll.u32 %s5519_s7, 4  ;;  %s5141_s20 = int_to_ptr.vmem [resolvable:$true] %s5140_s20 }
 0x618   :  { %p5482_p1 = scmp.lt.s32.totalorder %s5141_s20, %s5141_s20 }
 0x686   :  { %v5020_v44 = vpop.permute.xlu0 %5019 }
 0x687   :  { %v5022_v53 = vmul.f32 %v5020_v44, %v6453_v16  ;;  %v5023_v55 = vmul.f32 %v5020_v44, %v6457_v29  ;;  %v5024_v22 = vmul.f32 %v5020_v44, %v6462_v0  ;;  %v5025_v7 = vmul.f32 %v5020_v44, %v6469_v17 }
 0x688   :  { %v5026_v37 = vmul.f32 %v5020_v44, %v6471_v57 }
 0x68a   :  { %v5030_v26 = vpop.permute.xlu1 %5029  ;;  %v5055_v1 = vpop.permute.xlu0 %5054 }
 0x68b   :  { %v5032_v47 = vadd.f32 %v5030_v26, %v5022_v53  ;;  %v5033_v62 = vadd.f32 %v5030_v26, %v5023_v55  ;;  %v5034_v39 = vadd.f32 %v5030_v26, %v5024_v22  ;;  %v5035_v12 = vadd.f32 %v5030_v26, %v5025_v7 }
 0x68c   :  { %v5036_v11 = vadd.f32 %v5030_v26, %v5026_v37 }
 0x68d   :  { %v5068_v52 = vadd.f32 %v5058_v48, %v5032_v47  ;;  %v5069_v49 = vadd.f32 %v5059_v14, %v5033_v62 }
 0x68e   :  { %v5053_v31 = vpop.permute.xlu1 %5052 }
 0x68f   :  { %v5060_v16 = vsel %vm1194_vm6, %v5051_v42, %v5053_v31  ;;  %v5061_v29 = vsel %vm1194_vm6, %v5053_v31, %v5055_v1  ;;  %v5073_v9 = vmax.f32 %v5068_v52, 0.0  ;;  %v5074_v51 = vmax.f32 %v5069_v49, 0.0 }
 0x690   :  { %v5070_v58 = vadd.f32 %v5060_v16, %v5034_v39  ;;  %v5071_v32 = vadd.f32 %v5061_v29, %v5035_v12 }
 0x691   :  { %v5083_v46 = vcombine.low %v5073_v9, %v5074_v51 }
 0x692   :  { %v5075_v0 = vmax.f32 %v5070_v58, 0.0  ;;  %v5076_v36 = vmax.f32 %v5071_v32, 0.0  ;;  %v5057_v17 = vpop.permute.xlu1 %5056 }
 0x693   :  { %v5062_v3 = vsel %vm1194_vm6, %v5055_v1, %v5057_v17  ;;  %5085 = vrot.lane.b32.xlu0 %v5083_v46, %s5517_s4 }
 0x694   :  { %v5084_v43 = vcombine.low %v5075_v0, %v5076_v36  ;;  %v5072_v33 = vadd.f32 %v5062_v3, %v5036_v11 }
 0x696   :  { %v5077_v61 = vmax.f32 %v5072_v33, 0.0  ;;  %5087 = vrot.lane.b32.xlu1 %v5084_v43, %s5517_s4 }
 0x698   :  { %5089 = vrot.lane.b32.xlu0 %v5077_v61, %s5517_s4 }
 0x705   :  { %v5086_v38 = vpop.permute.xlu0 %5085 }
 0x706   :  { %v5091_v6 = vrot.slane %v5086_v38, 4 }
 0x708   :  { %v5094_v57 = vsel %vm2646_vm14, %v5091_v6, %v5086_v38  ;;  %v5088_v35 = vpop.permute.xlu1 %5087 }
 0x709   :  { %5102 = vst.msk [vmem:[#allocation3] sm:$0xff] %vm6098_vm15, %v5094_v57  ;;  %v5092_v56 = vrot.slane %v5088_v35, 4 }
 0x70a   :  { %v5090_v63 = vpop.permute.xlu0 %5089 }
 0x70b   :  { %v5095_v50 = vsel %vm135_vm11, %v5091_v6, %v5092_v56  ;;  %v5093_v24 = vrot.slane %v5090_v63, 4 }
 0x70c   :  { %v5096_v8 = vsel %vm2646_vm14, %v5095_v50, %v5088_v35 }
 0x70d   :  { %5103 = vst [vmem:[#allocation3 + $0x8] sm:$0xff] %v5096_v8  ;;  %v5097_v60 = vsel %vm135_vm11, %v5092_v56, %v5093_v24 }
 0x70e   :  { %v5098_v59 = vsel %vm2646_vm14, %v5097_v60, %v5090_v63 }
 0x70f   :  { %5104 = vst.msk [vmem:[#allocation3 + $0x10] sm:$0xff] %vm6106_vm10, %v5098_v59 }
 0x710   :  { %v5105_v19 = vld [vmem:[#allocation3] sm:$0xff] }
 0x711   :  { %5109 = vrot.lane.b32.xlu1 %v5105_v19, %s5513_s25 }
 0x714   :  { %v5106_v13 = vld [vmem:[#allocation3 + $0x8] sm:$0xf] }
 0x715   :  { %5111 = vrot.lane.b32.xlu0 %v5106_v13, %s5513_s25  ;;  %5123 = vrot.lane.b32.xlu1 %v5096_v8, %s5518_s6  ;;  %s5477_s25 = scalar_lea.vmem %s5141_s20, 256 }
 0x716   :  { %v5120_v21 = vld [vmem:[#allocation3 + $0x10] sm:$0xf]  ;;  %p5478_p0 = scmp.ne.s32.totalorder %s5141_s20, %s5477_s25  ;;  %p5483_p2 = scmp.lt.s32.totalorder %s5477_s25, %s5477_s25 }
 0x718   :  { %p5484_p3 = por %p5483_p2, %p5482_p1 }
 0x719   :  { %5125 = vrot.lane.b32.xlu0 %v5120_v21, %s5518_s6 }
 0x71a   :  { %p5485_p4 = pnand %p5484_p3, %p5478_p0 }
 0x783   :  { %v5110_v34 = vpop.permute.xlu1 %5109 }
 0x784   :  { %v5113_v20 = vrot.slane %v5110_v34, 4 }
 0x787   :  { %v5112_v10 = vpop.permute.xlu0 %5111  ;;  %v5124_v18 = vpop.permute.xlu1 %5123 }
 0x788   :  { %v5114_v54 = vrot.slane %v5112_v10, 4  ;;  %v5127_v2 = vrot.slane %v5124_v18, 4 }
 0x78a   :  { %v5115_v40 = vsel %vm135_vm11, %v5113_v20, %v5114_v54 }
 0x78b   :  { %v5116_v25 = vsel %vm2013_vm9, %v5110_v34, %v5115_v40  ;;  %v5126_v45 = vpop.permute.xlu0 %5125 }
 0x78c   :  { %5118 = vst [vmem:[#allocation4] sm:$0xff] %v5116_v25  ;;  %v5128_v15 = vrot.slane %v5126_v45, 4 }
 0x78e   :  { %v5129_v30 = vsel %vm135_vm11, %v5127_v2, %v5128_v15 }
 0x78f   :  { %v5131_v5 = vsel %vm5130_vm1, %v5124_v18, %v5129_v30 }
 0x790   :  { %5134 = vst [vmem:[#allocation4 + $0x8] sm:$0xff] %v5131_v5 }
 0x791   :  { %5488 = shalt.err (!%p5485_p4)
}
 0x792   :  { %s5520_s9 = smov 128   ;;  %s5521_s10 = smov 8  }
 0x793   :  { %5146 = dma.vmem_to_hbm [thread:$0]  %s5141_s20, 256, %s6538_s8, [#allocation5], %s5520_s9, %s5520_s9, %s5521_s10  }
 0x794   :  { %5497 = dma.done.wait [#allocation5], 256  }
 0x795   :  { %5498 = vsyncadd [#allocation5], 4294967040 }
 0x796   :  { %5150 = vsyncpa [#allocation5], 1 }

</bundles_post_ra>
